<compile_context>
chip_gen: v7x
topology: tpu7x:2x2x1
jax: 0.10.0
libtpu: 0.0.40
codegen_flags: <defaults>
</compile_context>

<pallas_src>
import jax
import jax.numpy as jnp
from jax.experimental import pallas as pl
from jax.experimental.pallas import tpu as pltpu


CPAD = 128  # lane-dense padded output-channel width


def _round_up(x, m):
    return ((x + m - 1) // m) * m


# ----------------------------------------------------------------------------
# Pallas kernels
# ----------------------------------------------------------------------------
def _conv_pool_relu_kernel(p_ref, w_ref, b_ref, o_ref):
    """Fused conv (im2col matmul) + bias + 2x2 maxpool + ReLU.

    p_ref: (4, tm, K) bf16 -- the 4 pool-phase patch blocks for the same
           (n, hp, wp) pooled positions.  w_ref: (K, CPAD).  b_ref: (1, CPAD).
    """
    w = w_ref[...]
    a0 = jnp.dot(p_ref[0], w, preferred_element_type=jnp.float32)
    a1 = jnp.dot(p_ref[1], w, preferred_element_type=jnp.float32)
    a2 = jnp.dot(p_ref[2], w, preferred_element_type=jnp.float32)
    a3 = jnp.dot(p_ref[3], w, preferred_element_type=jnp.float32)
    m = jnp.maximum(jnp.maximum(a0, a1), jnp.maximum(a2, a3))
    # bias is constant across a pool window -> add after the max, then ReLU
    o_ref[...] = jnp.maximum(m + b_ref[...], 0.0).astype(o_ref.dtype)


def _fc_tail_kernel(x_ref, w1_ref, b1_ref, w2_ref, b2_ref, o_ref):
    """Fused fc1 + ReLU + fc2 + log_softmax (all operands lane-padded to 128).

    b2 holds -1e9 in the padded logit lanes so they vanish under softmax.
    """
    h = jnp.dot(x_ref[...], w1_ref[...],
                preferred_element_type=jnp.float32) + b1_ref[...]
    h = jnp.maximum(h, 0.0)
    logits = jnp.dot(h, w2_ref[...],
                     preferred_element_type=jnp.float32) + b2_ref[...]
    mx = jnp.max(logits, axis=-1, keepdims=True)
    shifted = logits - mx
    lse = jnp.log(jnp.sum(jnp.exp(shifted), axis=-1, keepdims=True))
    o_ref[...] = (shifted - lse).astype(o_ref.dtype)


# ----------------------------------------------------------------------------
# Pallas wrappers
# ----------------------------------------------------------------------------
def _im2col_pool_grouped(x_nhwc, k):
    """Valid kxk patches, rows grouped by 2x2-pool phase.

    Returns (4, N*HP*WP, k*k*C): phases[p][n*HP*WP + hp*WP + wp] is the patch
    of conv-output position (2*hp + dyp, 2*wp + dxp).  Column order is
    (dy, dx, cin), matching the (KH, KW, Cin, Cout) weight flattening.
    """
    N, H, W, C = x_nhwc.shape
    OH, OW = H - k + 1, W - k + 1
    HP, WP = OH // 2, OW // 2
    cols = jnp.concatenate(
        [x_nhwc[:, dy:dy + OH, dx:dx + OW, :]
         for dy in range(k) for dx in range(k)],
        axis=-1)                                    # (N, OH, OW, k*k*C)
    phases = jnp.stack(
        [cols[:, dyp:2 * HP:2, dxp:2 * WP:2, :].reshape(N * HP * WP, k * k * C)
         for dyp in (0, 1) for dxp in (0, 1)],
        axis=0)                                     # (4, N*HP*WP, k*k*C)
    return phases, (HP, WP)


def conv_pool_relu(x_nhwc, w_pad, b_pad, k, *, rows_tile=512):
    """conv(k x k, valid) + bias + maxpool(2x2) + ReLU, lane-padded to CPAD."""
    N = x_nhwc.shape[0]
    phases, (HP, WP) = _im2col_pool_grouped(x_nhwc, k)
    phases = phases.astype(w_pad.dtype)             # bf16 patches
    _, M, K = phases.shape
    cpad = w_pad.shape[1]

    tm = min(rows_tile, _round_up(M, 16))           # 16: bf16 sublane tile
    Mp = _round_up(M, tm)
    if Mp != M:
        phases = jnp.pad(phases, ((0, 0), (0, Mp - M), (0, 0)))

    out = pl.pallas_call(
        _conv_pool_relu_kernel,
        out_shape=jax.ShapeDtypeStruct((Mp, cpad), jnp.float32),
        grid=(Mp // tm,),
        in_specs=[
            pl.BlockSpec((4, tm, K), lambda i: (0, i, 0)),
            pl.BlockSpec((K, cpad), lambda i: (0, 0)),
            pl.BlockSpec((1, cpad), lambda i: (0, 0)),
        ],
        out_specs=pl.BlockSpec((tm, cpad), lambda i: (i, 0)),
        compiler_params=pltpu.CompilerParams(
            dimension_semantics=("parallel",)),
    )(phases, w_pad, b_pad)
    return out[:M].reshape(N, HP, WP, cpad)


def fc_tail(flat, w1, b1, w2, b2, *, rows_tile=256):
    """fc1 + ReLU + fc2 + log_softmax; returns (M, CPAD) padded log-probs."""
    M, K = flat.shape
    cpad = w1.shape[1]
    tm = min(rows_tile, _round_up(M, 8))
    Mp = _round_up(M, tm)
    if Mp != M:
        flat = jnp.pad(flat, ((0, Mp - M), (0, 0)))

    out = pl.pallas_call(
        _fc_tail_kernel,
        out_shape=jax.ShapeDtypeStruct((Mp, cpad), jnp.float32),
        grid=(Mp // tm,),
        in_specs=[
            pl.BlockSpec((tm, K), lambda i: (i, 0)),
            pl.BlockSpec((K, cpad), lambda i: (0, 0)),
            pl.BlockSpec((1, cpad), lambda i: (0, 0)),
            pl.BlockSpec((cpad, cpad), lambda i: (0, 0)),
            pl.BlockSpec((1, cpad), lambda i: (0, 0)),
        ],
        out_specs=pl.BlockSpec((tm, cpad), lambda i: (i, 0)),
        compiler_params=pltpu.CompilerParams(
            dimension_semantics=("parallel",)),
    )(flat, w1, b1, w2, b2)
    return out[:M]


# ----------------------------------------------------------------------------
# Parameters
# ----------------------------------------------------------------------------
def init_params(key):
    """Deterministic PyTorch-style uniform(-1/sqrt(fan_in), +1/sqrt(fan_in))."""
    ks = jax.random.split(key, 8)

    def u(k, shape, fan_in):
        bound = 1.0 / jnp.sqrt(jnp.float32(fan_in))
        return jax.random.uniform(k, shape, jnp.float32, -bound, bound)

    return {
        "conv1_w": u(ks[0], (10, 1, 5, 5), 1 * 5 * 5),    # (Cout, Cin, KH, KW)
        "conv1_b": u(ks[1], (10,), 1 * 5 * 5),
        "conv2_w": u(ks[2], (20, 10, 5, 5), 10 * 5 * 5),
        "conv2_b": u(ks[3], (20,), 10 * 5 * 5),
        "fc1_w": u(ks[4], (50, 320), 320),                 # (out, in)
        "fc1_b": u(ks[5], (50,), 320),
        "fc2_w": u(ks[6], (10, 50), 50),
        "fc2_b": u(ks[7], (10,), 50),
    }


def prepare_params(params, cpad=CPAD):
    """One-time weight layout prep: transpose/reshape, lane-pad to `cpad`,
    fold the NCHW->NHWC flatten into fc1's columns, bf16 for conv weights."""
    def pad_cols(a, n):
        return jnp.pad(a, ((0, 0), (0, n - a.shape[1])))

    def conv_w(w):                       # (Cout,Cin,KH,KW) -> (KH*KW*Cin, cpad)
        cout = w.shape[0]
        wm = jnp.transpose(w, (2, 3, 1, 0)).reshape(-1, cout)
        return pad_cols(wm, cpad).astype(jnp.bfloat16)

    def bias_row(b):
        return pad_cols(b.reshape(1, -1).astype(jnp.float32), cpad)

    # fc1: inputs ordered (C=20,H=4,W=4) in PyTorch's view(-1,320); reorder to
    # (H,W,C) so it matches our NHWC flatten, transpose to (in,out), lane-pad.
    w1 = params["fc1_w"].reshape(50, 20, 4, 4).transpose(0, 2, 3, 1)
    w1 = pad_cols(w1.reshape(50, 320).T, cpad).astype(jnp.float32)   # (320,128)

    # fc2: (10,50) -> (50,10); pad rows (dead fc1 lanes) and cols with zeros.
    w2 = jnp.pad(params["fc2_w"].T, ((0, cpad - 50), (0, cpad - 10)))
    w2 = w2.astype(jnp.float32)
    # padded logit lanes get -1e9 bias so they vanish under log_softmax
    b2 = jnp.full((1, cpad), -1e9, jnp.float32).at[0, :10].set(params["fc2_b"])

    return {
        "conv1_w": conv_w(params["conv1_w"]), "conv1_b": bias_row(params["conv1_b"]),
        "conv2_w": conv_w(params["conv2_w"]), "conv2_b": bias_row(params["conv2_b"]),
        "fc1_w": w1, "fc1_b": bias_row(params["fc1_b"]),
        "fc2_w": w2, "fc2_b": b2,
    }


# ----------------------------------------------------------------------------
# Forward pass
# ----------------------------------------------------------------------------
def net_forward(prep, x_nchw):
    N = x_nchw.shape[0]
    x = jnp.transpose(x_nchw, (0, 2, 3, 1))                 # NCHW -> NHWC

    # conv1 (1->10, k=5) + pool + relu, fused           -> (N, 12, 12, 128)
    y1 = conv_pool_relu(x, prep["conv1_w"], prep["conv1_b"], 5)
    y1 = y1[..., :10]                                        # true channels

    # conv2 (10->20, k=5) [Dropout2d = identity] + pool + relu -> (N,4,4,128)
    y2 = conv_pool_relu(y1, prep["conv2_w"], prep["conv2_b"], 5)

    # NHWC flatten (the NCHW view(-1,320) permutation lives in fc1's weights)
    flat = y2[..., :20].reshape(N, 320)

    # fc1 + relu [dropout = identity] + fc2 + log_softmax, fused
    out = fc_tail(flat, prep["fc1_w"], prep["fc1_b"],
                  prep["fc2_w"], prep["fc2_b"])              # (N, 128)
    return out[:, :10]


# ----------------------------------------------------------------------------
# Pure-JAX reference (same bf16-in / f32-accumulate convs) for validation
# ----------------------------------------------------------------------------
def reference_forward(params, x_nchw):
    def conv(x, w, b):
        y = jax.lax.conv_general_dilated(
            x.astype(jnp.bfloat16), w.astype(jnp.bfloat16),
            window_strides=(1, 1), padding="VALID",
            dimension_numbers=("NCHW", "OIHW", "NCHW"),
            preferred_element_type=jnp.float32)
        return y + b.reshape(1, -1, 1, 1)

    def maxpool2(x):
        return jax.lax.reduce_window(x, -jnp.inf, jax.lax.max,
                                     (1, 1, 2, 2), (1, 1, 2, 2), "VALID")

    x = jax.nn.relu(maxpool2(conv(x_nchw, params["conv1_w"], params["conv1_b"])))
    x = jax.nn.relu(maxpool2(conv(x, params["conv2_w"], params["conv2_b"])))
    x = x.reshape(x.shape[0], -1)                            # NCHW flatten
    x = jax.nn.relu(x @ params["fc1_w"].T + params["fc1_b"])
    x = x @ params["fc2_w"].T + params["fc2_b"]
    return jax.nn.log_softmax(x, axis=-1)


if __name__ == "__main__":
    key = jax.random.PRNGKey(0)
    pkey, xkey = jax.random.split(key)
    params = init_params(pkey)
    prep = prepare_params(params)                     # one-time layout prep
    x = jax.random.normal(xkey, (2, 1, 28, 28), jnp.float32)

    out = jax.jit(net_forward)(prep, x)
    out = jax.block_until_ready(out)

    assert out.shape == (2, 10) and out.dtype == jnp.float32
    # log_softmax rows should exponentiate-sum to ~1
    assert jnp.allclose(jnp.sum(jnp.exp(out), axis=1), 1.0, atol=1e-4)
    # match the pure-JAX reference (bf16 conv inputs, f32 accumulation)
    ref = jax.block_until_ready(reference_forward(params, x))
    assert jnp.allclose(out, ref, atol=5e-2), (out, ref)
    print("KERNEL_OK")
</pallas_src>

<mosaic_0001>
module attributes {stable_mosaic.version = 11 : i64} {
  func.func @_conv_pool_relu_kernel(%arg0: i32, %arg1: memref<4x288x25xbf16, #tpu.memory_space<vmem>>, %arg2: memref<25x128xbf16, #tpu.memory_space<vmem>>, %arg3: memref<1x128xf32, #tpu.memory_space<vmem>>, %arg4: memref<288x128xf32, #tpu.memory_space<vmem>>) attributes {dimension_semantics = [#tpu.dimension_semantics<parallel>], iteration_bounds = array<i64: 1>, scalar_prefetch = 0 : i64, scratch_operands = 0 : i64, tpu.core_type = #tpu.core_type<tc>, window_params = [{transform_indices = @transform_0, window_bounds = array<i64: 4, 288, 25>}, {pipeline_mode = #tpu.pipeline_mode<synchronous>, transform_indices = @transform_1, window_bounds = array<i64: 25, 128>}, {pipeline_mode = #tpu.pipeline_mode<synchronous>, transform_indices = @transform_2, window_bounds = array<i64: 1, 128>}, {transform_indices = @transform_3, window_bounds = array<i64: 288, 128>}]} {
    %c0 = arith.constant 0 : index
    %c0_0 = arith.constant 0 : index
    %0 = vector.load %arg2[%c0, %c0_0] : memref<25x128xbf16, #tpu.memory_space<vmem>>, vector<25x128xbf16>
    %c0_1 = arith.constant 0 : index
    %c0_2 = arith.constant 0 : index
    %c0_3 = arith.constant 0 : index
    %1 = vector.load %arg1[%c0_1, %c0_2, %c0_3] : memref<4x288x25xbf16, #tpu.memory_space<vmem>>, vector<1x288x25xbf16>
    %2 = vector.shape_cast %1 : vector<1x288x25xbf16> to vector<288x25xbf16>
    %cst = arith.constant dense<0.000000e+00> : vector<288x128xf32>
    %3 = tpu.matmul %2, %0, %cst {dimension_numbers = #tpu.dot_dimension_numbers<[1], [0], [0], [1], [0, 0, 1, 1], [], []>} : vector<288x25xbf16>, vector<25x128xbf16>, vector<288x128xf32> -> vector<288x128xf32>
    %c1 = arith.constant 1 : index
    %c0_4 = arith.constant 0 : index
    %c0_5 = arith.constant 0 : index
    %4 = vector.load %arg1[%c1, %c0_4, %c0_5] : memref<4x288x25xbf16, #tpu.memory_space<vmem>>, vector<1x288x25xbf16>
    %5 = vector.shape_cast %4 : vector<1x288x25xbf16> to vector<288x25xbf16>
    %cst_6 = arith.constant dense<0.000000e+00> : vector<288x128xf32>
    %6 = tpu.matmul %5, %0, %cst_6 {dimension_numbers = #tpu.dot_dimension_numbers<[1], [0], [0], [1], [0, 0, 1, 1], [], []>} : vector<288x25xbf16>, vector<25x128xbf16>, vector<288x128xf32> -> vector<288x128xf32>
    %c2 = arith.constant 2 : index
    %c0_7 = arith.constant 0 : index
    %c0_8 = arith.constant 0 : index
    %7 = vector.load %arg1[%c2, %c0_7, %c0_8] : memref<4x288x25xbf16, #tpu.memory_space<vmem>>, vector<1x288x25xbf16>
    %8 = vector.shape_cast %7 : vector<1x288x25xbf16> to vector<288x25xbf16>
    %cst_9 = arith.constant dense<0.000000e+00> : vector<288x128xf32>
    %9 = tpu.matmul %8, %0, %cst_9 {dimension_numbers = #tpu.dot_dimension_numbers<[1], [0], [0], [1], [0, 0, 1, 1], [], []>} : vector<288x25xbf16>, vector<25x128xbf16>, vector<288x128xf32> -> vector<288x128xf32>
    %c3 = arith.constant 3 : index
    %c0_10 = arith.constant 0 : index
    %c0_11 = arith.constant 0 : index
    %10 = vector.load %arg1[%c3, %c0_10, %c0_11] : memref<4x288x25xbf16, #tpu.memory_space<vmem>>, vector<1x288x25xbf16>
    %11 = vector.shape_cast %10 : vector<1x288x25xbf16> to vector<288x25xbf16>
    %cst_12 = arith.constant dense<0.000000e+00> : vector<288x128xf32>
    %12 = tpu.matmul %11, %0, %cst_12 {dimension_numbers = #tpu.dot_dimension_numbers<[1], [0], [0], [1], [0, 0, 1, 1], [], []>} : vector<288x25xbf16>, vector<25x128xbf16>, vector<288x128xf32> -> vector<288x128xf32>
    %13 = arith.maximumf %3, %6 : vector<288x128xf32>
    %14 = arith.maximumf %9, %12 : vector<288x128xf32>
    %15 = arith.maximumf %13, %14 : vector<288x128xf32>
    %c0_13 = arith.constant 0 : index
    %c0_14 = arith.constant 0 : index
    %16 = vector.load %arg3[%c0_13, %c0_14] : memref<1x128xf32, #tpu.memory_space<vmem>>, vector<1x128xf32>
    %17 = vector.broadcast %16 : vector<1x128xf32> to vector<288x128xf32>
    %18 = arith.addf %15, %17 : vector<288x128xf32>
    %cst_15 = arith.constant 0.000000e+00 : f32
    %19 = vector.broadcast %cst_15 : f32 to vector<288x128xf32>
    %20 = arith.maximumf %18, %19 : vector<288x128xf32>
    %c0_16 = arith.constant 0 : index
    %c0_17 = arith.constant 0 : index
    %21 = vector.load %arg4[%c0_16, %c0_17] : memref<288x128xf32, #tpu.memory_space<vmem>>, vector<288x128xf32>
    tpu.vector_store %arg4[%c0_16, %c0_17], %20 {strides = array<i32>} : memref<288x128xf32, #tpu.memory_space<vmem>>, vector<288x128xf32>,
    return
  }
  func.func @transform_0(%arg0: i32) -> (i32, i32, i32) {
    %c0_i32 = arith.constant 0 : i32
    %c0_i32_0 = arith.constant 0 : i32
    %c0_i32_1 = arith.constant 0 : i32
    return %c0_i32, %arg0, %c0_i32_0 : i32, i32, i32
  }
  func.func @transform_1(%arg0: i32) -> (i32, i32) {
    %c0_i32 = arith.constant 0 : i32
    %c0_i32_0 = arith.constant 0 : i32
    %c0_i32_1 = arith.constant 0 : i32
    return %c0_i32, %c0_i32_0 : i32, i32
  }
  func.func @transform_2(%arg0: i32) -> (i32, i32) {
    %c0_i32 = arith.constant 0 : i32
    %c0_i32_0 = arith.constant 0 : i32
    %c0_i32_1 = arith.constant 0 : i32
    return %c0_i32, %c0_i32_0 : i32, i32
  }
  func.func @transform_3(%arg0: i32) -> (i32, i32) {
    %c0_i32 = arith.constant 0 : i32
    %c0_i32_0 = arith.constant 0 : i32
    return %arg0, %c0_i32 : i32, i32
  }
}

module attributes {stable_mosaic.version = 11 : i64} {
  func.func @_conv_pool_relu_kernel(%arg0: i32, %arg1: memref<4x32x250xbf16, #tpu.memory_space<vmem>>, %arg2: memref<250x128xbf16, #tpu.memory_space<vmem>>, %arg3: memref<1x128xf32, #tpu.memory_space<vmem>>, %arg4: memref<32x128xf32, #tpu.memory_space<vmem>>) attributes {dimension_semantics = [#tpu.dimension_semantics<parallel>], iteration_bounds = array<i64: 1>, scalar_prefetch = 0 : i64, scratch_operands = 0 : i64, tpu.core_type = #tpu.core_type<tc>, window_params = [{transform_indices = @transform_0, window_bounds = array<i64: 4, 32, 250>}, {pipeline_mode = #tpu.pipeline_mode<synchronous>, transform_indices = @transform_1, window_bounds = array<i64: 250, 128>}, {pipeline_mode = #tpu.pipeline_mode<synchronous>, transform_indices = @transform_2, window_bounds = array<i64: 1, 128>}, {transform_indices = @transform_3, window_bounds = array<i64: 32, 128>}]} {
    %c0 = arith.constant 0 : index
    %c0_0 = arith.constant 0 : index
    %0 = vector.load %arg2[%c0, %c0_0] : memref<250x128xbf16, #tpu.memory_space<vmem>>, vector<250x128xbf16>
    %c0_1 = arith.constant 0 : index
    %c0_2 = arith.constant 0 : index
    %c0_3 = arith.constant 0 : index
    %1 = vector.load %arg1[%c0_1, %c0_2, %c0_3] : memref<4x32x250xbf16, #tpu.memory_space<vmem>>, vector<1x32x250xbf16>
    %2 = vector.shape_cast %1 : vector<1x32x250xbf16> to vector<32x250xbf16>
    %cst = arith.constant dense<0.000000e+00> : vector<32x128xf32>
    %3 = tpu.matmul %2, %0, %cst {dimension_numbers = #tpu.dot_dimension_numbers<[1], [0], [0], [1], [0, 0, 1, 1], [], []>} : vector<32x250xbf16>, vector<250x128xbf16>, vector<32x128xf32> -> vector<32x128xf32>
    %c1 = arith.constant 1 : index
    %c0_4 = arith.constant 0 : index
    %c0_5 = arith.constant 0 : index
    %4 = vector.load %arg1[%c1, %c0_4, %c0_5] : memref<4x32x250xbf16, #tpu.memory_space<vmem>>, vector<1x32x250xbf16>
    %5 = vector.shape_cast %4 : vector<1x32x250xbf16> to vector<32x250xbf16>
    %cst_6 = arith.constant dense<0.000000e+00> : vector<32x128xf32>
    %6 = tpu.matmul %5, %0, %cst_6 {dimension_numbers = #tpu.dot_dimension_numbers<[1], [0], [0], [1], [0, 0, 1, 1], [], []>} : vector<32x250xbf16>, vector<250x128xbf16>, vector<32x128xf32> -> vector<32x128xf32>
    %c2 = arith.constant 2 : index
    %c0_7 = arith.constant 0 : index
    %c0_8 = arith.constant 0 : index
    %7 = vector.load %arg1[%c2, %c0_7, %c0_8] : memref<4x32x250xbf16, #tpu.memory_space<vmem>>, vector<1x32x250xbf16>
    %8 = vector.shape_cast %7 : vector<1x32x250xbf16> to vector<32x250xbf16>
    %cst_9 = arith.constant dense<0.000000e+00> : vector<32x128xf32>
    %9 = tpu.matmul %8, %0, %cst_9 {dimension_numbers = #tpu.dot_dimension_numbers<[1], [0], [0], [1], [0, 0, 1, 1], [], []>} : vector<32x250xbf16>, vector<250x128xbf16>, vector<32x128xf32> -> vector<32x128xf32>
    %c3 = arith.constant 3 : index
    %c0_10 = arith.constant 0 : index
    %c0_11 = arith.constant 0 : index
    %10 = vector.load %arg1[%c3, %c0_10, %c0_11] : memref<4x32x250xbf16, #tpu.memory_space<vmem>>, vector<1x32x250xbf16>
    %11 = vector.shape_cast %10 : vector<1x32x250xbf16> to vector<32x250xbf16>
    %cst_12 = arith.constant dense<0.000000e+00> : vector<32x128xf32>
    %12 = tpu.matmul %11, %0, %cst_12 {dimension_numbers = #tpu.dot_dimension_numbers<[1], [0], [0], [1], [0, 0, 1, 1], [], []>} : vector<32x250xbf16>, vector<250x128xbf16>, vector<32x128xf32> -> vector<32x128xf32>
    %13 = arith.maximumf %3, %6 : vector<32x128xf32>
    %14 = arith.maximumf %9, %12 : vector<32x128xf32>
    %15 = arith.maximumf %13, %14 : vector<32x128xf32>
    %c0_13 = arith.constant 0 : index
    %c0_14 = arith.constant 0 : index
    %16 = vector.load %arg3[%c0_13, %c0_14] : memref<1x128xf32, #tpu.memory_space<vmem>>, vector<1x128xf32>
    %17 = vector.broadcast %16 : vector<1x128xf32> to vector<32x128xf32>
    %18 = arith.addf %15, %17 : vector<32x128xf32>
    %cst_15 = arith.constant 0.000000e+00 : f32
    %19 = vector.broadcast %cst_15 : f32 to vector<32x128xf32>
    %20 = arith.maximumf %18, %19 : vector<32x128xf32>
    %c0_16 = arith.constant 0 : index
    %c0_17 = arith.constant 0 : index
    %21 = vector.load %arg4[%c0_16, %c0_17] : memref<32x128xf32, #tpu.memory_space<vmem>>, vector<32x128xf32>
    tpu.vector_store %arg4[%c0_16, %c0_17], %20 {strides = array<i32>} : memref<32x128xf32, #tpu.memory_space<vmem>>, vector<32x128xf32>,
    return
  }
  func.func @transform_0(%arg0: i32) -> (i32, i32, i32) {
    %c0_i32 = arith.constant 0 : i32
    %c0_i32_0 = arith.constant 0 : i32
    %c0_i32_1 = arith.constant 0 : i32
    return %c0_i32, %arg0, %c0_i32_0 : i32, i32, i32
  }
  func.func @transform_1(%arg0: i32) -> (i32, i32) {
    %c0_i32 = arith.constant 0 : i32
    %c0_i32_0 = arith.constant 0 : i32
    %c0_i32_1 = arith.constant 0 : i32
    return %c0_i32, %c0_i32_0 : i32, i32
  }
  func.func @transform_2(%arg0: i32) -> (i32, i32) {
    %c0_i32 = arith.constant 0 : i32
    %c0_i32_0 = arith.constant 0 : i32
    %c0_i32_1 = arith.constant 0 : i32
    return %c0_i32, %c0_i32_0 : i32, i32
  }
  func.func @transform_3(%arg0: i32) -> (i32, i32) {
    %c0_i32 = arith.constant 0 : i32
    %c0_i32_0 = arith.constant 0 : i32
    return %arg0, %c0_i32 : i32, i32
  }
}

module attributes {stable_mosaic.version = 11 : i64} {
  func.func @_fc_tail_kernel(%arg0: i32, %arg1: memref<8x320xf32, #tpu.memory_space<vmem>>, %arg2: memref<320x128xf32, #tpu.memory_space<vmem>>, %arg3: memref<1x128xf32, #tpu.memory_space<vmem>>, %arg4: memref<128x128xf32, #tpu.memory_space<vmem>>, %arg5: memref<1x128xf32, #tpu.memory_space<vmem>>, %arg6: memref<8x128xf32, #tpu.memory_space<vmem>>) attributes {dimension_semantics = [#tpu.dimension_semantics<parallel>], iteration_bounds = array<i64: 1>, scalar_prefetch = 0 : i64, scratch_operands = 0 : i64, tpu.core_type = #tpu.core_type<tc>, window_params = [{transform_indices = @transform_0, window_bounds = array<i64: 8, 320>}, {pipeline_mode = #tpu.pipeline_mode<synchronous>, transform_indices = @transform_1, window_bounds = array<i64: 320, 128>}, {pipeline_mode = #tpu.pipeline_mode<synchronous>, transform_indices = @transform_2, window_bounds = array<i64: 1, 128>}, {pipeline_mode = #tpu.pipeline_mode<synchronous>, transform_indices = @transform_3, window_bounds = array<i64: 128, 128>}, {pipeline_mode = #tpu.pipeline_mode<synchronous>, transform_indices = @transform_4, window_bounds = array<i64: 1, 128>}, {transform_indices = @transform_5, window_bounds = array<i64: 8, 128>}]} {
    %c0 = arith.constant 0 : index
    %c0_0 = arith.constant 0 : index
    %0 = vector.load %arg1[%c0, %c0_0] : memref<8x320xf32, #tpu.memory_space<vmem>>, vector<8x320xf32>
    %c0_1 = arith.constant 0 : index
    %c0_2 = arith.constant 0 : index
    %1 = vector.load %arg2[%c0_1, %c0_2] : memref<320x128xf32, #tpu.memory_space<vmem>>, vector<320x128xf32>
    %cst = arith.constant dense<0.000000e+00> : vector<8x128xf32>
    %2 = tpu.matmul %0, %1, %cst {dimension_numbers = #tpu.dot_dimension_numbers<[1], [0], [0], [1], [0, 0, 1, 1], [], []>} : vector<8x320xf32>, vector<320x128xf32>, vector<8x128xf32> -> vector<8x128xf32>
    %c0_3 = arith.constant 0 : index
    %c0_4 = arith.constant 0 : index
    %3 = vector.load %arg3[%c0_3, %c0_4] : memref<1x128xf32, #tpu.memory_space<vmem>>, vector<1x128xf32>
    %4 = vector.broadcast %3 : vector<1x128xf32> to vector<8x128xf32>
    %5 = arith.addf %2, %4 : vector<8x128xf32>
    %cst_5 = arith.constant 0.000000e+00 : f32
    %6 = vector.broadcast %cst_5 : f32 to vector<8x128xf32>
    %7 = arith.maximumf %5, %6 : vector<8x128xf32>
    %c0_6 = arith.constant 0 : index
    %c0_7 = arith.constant 0 : index
    %8 = vector.load %arg4[%c0_6, %c0_7] : memref<128x128xf32, #tpu.memory_space<vmem>>, vector<128x128xf32>
    %cst_8 = arith.constant dense<0.000000e+00> : vector<8x128xf32>
    %9 = tpu.matmul %7, %8, %cst_8 {dimension_numbers = #tpu.dot_dimension_numbers<[1], [0], [0], [1], [0, 0, 1, 1], [], []>} : vector<8x128xf32>, vector<128x128xf32>, vector<8x128xf32> -> vector<8x128xf32>
    %c0_9 = arith.constant 0 : index
    %c0_10 = arith.constant 0 : index
    %10 = vector.load %arg5[%c0_9, %c0_10] : memref<1x128xf32, #tpu.memory_space<vmem>>, vector<1x128xf32>
    %11 = vector.broadcast %10 : vector<1x128xf32> to vector<8x128xf32>
    %12 = arith.addf %9, %11 : vector<8x128xf32>
    %cst_11 = arith.constant dense<0xFF800000> : vector<8xf32>
    %13 = vector.multi_reduction <maximumf>, %12, %cst_11 [1] : vector<8x128xf32> to vector<8xf32>
    %14 = vector.shape_cast %13 : vector<8xf32> to vector<8x1xf32>
    %15 = vector.broadcast %14 : vector<8x1xf32> to vector<8x128xf32>
    %16 = arith.subf %12, %15 : vector<8x128xf32>
    %17 = math.exp %16 : vector<8x128xf32>
    %cst_12 = arith.constant dense<0.000000e+00> : vector<8xf32>
    %18 = vector.multi_reduction <add>, %17, %cst_12 [1] : vector<8x128xf32> to vector<8xf32>
    %19 = vector.shape_cast %18 : vector<8xf32> to vector<8x1xf32>
    %20 = math.log %19 : vector<8x1xf32>
    %21 = vector.broadcast %20 : vector<8x1xf32> to vector<8x128xf32>
    %22 = arith.subf %16, %21 : vector<8x128xf32>
    %c0_13 = arith.constant 0 : index
    %c0_14 = arith.constant 0 : index
    %23 = vector.load %arg6[%c0_13, %c0_14] : memref<8x128xf32, #tpu.memory_space<vmem>>, vector<8x128xf32>
    tpu.vector_store %arg6[%c0_13, %c0_14], %22 {strides = array<i32>} : memref<8x128xf32, #tpu.memory_space<vmem>>, vector<8x128xf32>,
    return
  }
  func.func @transform_0(%arg0: i32) -> (i32, i32) {
    %c0_i32 = arith.constant 0 : i32
    %c0_i32_0 = arith.constant 0 : i32
    return %arg0, %c0_i32 : i32, i32
  }
  func.func @transform_1(%arg0: i32) -> (i32, i32) {
    %c0_i32 = arith.constant 0 : i32
    %c0_i32_0 = arith.constant 0 : i32
    %c0_i32_1 = arith.constant 0 : i32
    return %c0_i32, %c0_i32_0 : i32, i32
  }
  func.func @transform_2(%arg0: i32) -> (i32, i32) {
    %c0_i32 = arith.constant 0 : i32
    %c0_i32_0 = arith.constant 0 : i32
    %c0_i32_1 = arith.constant 0 : i32
    return %c0_i32, %c0_i32_0 : i32, i32
  }
  func.func @transform_3(%arg0: i32) -> (i32, i32) {
    %c0_i32 = arith.constant 0 : i32
    %c0_i32_0 = arith.constant 0 : i32
    %c0_i32_1 = arith.constant 0 : i32
    return %c0_i32, %c0_i32_0 : i32, i32
  }
  func.func @transform_4(%arg0: i32) -> (i32, i32) {
    %c0_i32 = arith.constant 0 : i32
    %c0_i32_0 = arith.constant 0 : i32
    %c0_i32_1 = arith.constant 0 : i32
    return %c0_i32, %c0_i32_0 : i32, i32
  }
  func.func @transform_5(%arg0: i32) -> (i32, i32) {
    %c0_i32 = arith.constant 0 : i32
    %c0_i32_0 = arith.constant 0 : i32
    return %arg0, %c0_i32 : i32, i32
  }
}

</mosaic_0001>

<bundles_post_ra>
// kernel: net_forward.3
= control target key start
LH: loop header
LB: loop body
LE: loop exit
PB: predicated region body
PF: predicated region fallthrough
CT: control target
= control target key end

     0   :  { %vm211_vm0 = vcmask 1043456   ;;  %vm212_vm1 = vcmask 1044480   ;;  %vm156_vm2 = vcmask 203776   ;;  %v2266_v1 = vmov 65535   ;;  %s3054_s1 = inlined_call_operand.vmem [shape: bf16[25,128], index: 1, kind: input, shape index: {}]   ;;  %s3055_s0 = inlined_call_operand.vmem [shape: bf16[4,288,25], index: 0, kind: input, shape index: {}]   ;;  %s3056_s2 = inlined_call_operand.vmem [shape: f32[1,128], index: 2, kind: input, shape index: {}]   ;;  %s3057_s3 = inlined_call_operand.vmem [shape: f32[288,128], index: 3, kind: output, shape index: {}]  }
   0x1   :  { %v2192_v0 = vld [vmem:[%s3054_s1] sm:$0xff]   ;;  %v213_v2 = vsel %vm211_vm0, 4294967295, %v2266_v1  ;;  %v2193_v3 = vld [vmem:[%s3054_s1 + $0x8] sm:$0x1f]   ;;  %v2195_v7 = vld [vmem:[%s3055_s0 + $0x90] sm:$0xff]  }
   0x2   :  { %2031 = vmatprep.subr.bf16.mxu0 %v2192_v0  ;;  %2071 = vmatprep.subr.bf16.mxu1 %v2192_v0  ;;  %v214_v4 = vsel %vm212_vm1, %v213_v2, 0  ;;  %v2194_v5 = vld [vmem:[%s3055_s0] sm:$0xff]   ;;  %v2196_v8 = vld [vmem:[%s3055_s0 + $0x8] sm:$0xff]   ;;  %v2197_v9 = vld [vmem:[%s3055_s0 + $0x98] sm:$0xff]  }
   0x3   :  { %2032 = vmatpush3.bf16.msra.mxu0 %v2192_v0  ;;  %2072 = vmatpush3.bf16.msra.mxu1 %v2192_v0  ;;  %v216_v6 = vand.u32 %v2193_v3, %v214_v4  ;;  %v2198_v10 = vld [vmem:[%s3055_s0 + $0x10] sm:$0xff]   ;;  %v2199_v11 = vld [vmem:[%s3055_s0 + $0xa0] sm:$0xff]   ;;  %v2200_v12 = vld [vmem:[%s3055_s0 + $0x18] sm:$0xff]  }
   0x4   :  { %2035 = vmatprep.mubr.msk.bf16.mxu0 %vm156_vm2, %v2194_v5  ;;  %2075 = vmatprep.mubr.msk.bf16.mxu1 %vm156_vm2, %v2195_v7  ;;  %v2201_v13 = vld [vmem:[%s3055_s0 + $0xa8] sm:$0xff]   ;;  %v2202_v14 = vld [vmem:[%s3055_s0 + $0x20] sm:$0xff]   ;;  %v2203_v15 = vld [vmem:[%s3055_s0 + $0xb0] sm:$0xff]  }
   0x5   :  { %2033 = vmatprep.subr.bf16.mxu0 %v216_v6  ;;  %2073 = vmatprep.subr.bf16.mxu1 %v216_v6  ;;  %v2204_v16 = vld [vmem:[%s3055_s0 + $0x28] sm:$0xff]   ;;  %v2205_v17 = vld [vmem:[%s3055_s0 + $0xb8] sm:$0xff]   ;;  %v2206_v18 = vld [vmem:[%s3055_s0 + $0x30] sm:$0xff]  }
   0x6   :  { %v2207_v19 = vld [vmem:[%s3055_s0 + $0xc0] sm:$0xff]   ;;  %v2208_v20 = vld [vmem:[%s3055_s0 + $0x38] sm:$0xff]   ;;  %v2209_v21 = vld [vmem:[%s3055_s0 + $0xc8] sm:$0xff]  }
   0x7   :  { %2034 = vmatpush3.bf16.msra.mxu0 %v216_v6  ;;  %2074 = vmatpush3.bf16.msra.mxu1 %v216_v6  ;;  %v2210_v22 = vld [vmem:[%s3055_s0 + $0x40] sm:$0xff]   ;;  %v2211_v23 = vld [vmem:[%s3055_s0 + $0xd0] sm:$0xff]   ;;  %v2212_v24 = vld [vmem:[%s3055_s0 + $0x48] sm:$0xff]  }
   0x8   :  { %2111 = vmatprep.subr.bf16.mxu0 %v2192_v0  ;;  %2151 = vmatprep.subr.bf16.mxu1 %v2192_v0  ;;  %v2213_v25 = vld [vmem:[%s3055_s0 + $0xd8] sm:$0xff]   ;;  %v2214_v26 = vld [vmem:[%s3055_s0 + $0x50] sm:$0xff]   ;;  %v2215_v27 = vld [vmem:[%s3055_s0 + $0xe0] sm:$0xff]  }
   0x9   :  { %v2216_v28 = vld [vmem:[%s3055_s0 + $0x58] sm:$0xff]   ;;  %v2217_v29 = vld [vmem:[%s3055_s0 + $0xe8] sm:$0xff]   ;;  %v2218_v30 = vld [vmem:[%s3055_s0 + $0x60] sm:$0xff]  }
   0xa   :  { %2036 = vmatmul.mubr.msk.bf16.vlgmr.msra.gmra.mrb[0].mxu0 %vm156_vm2, %v2196_v8  ;;  %2076 = vmatmul.mubr.msk.bf16.vlgmr.msra.gmra.mrb[0].mxu1 %vm156_vm2, %v2197_v9  ;;  %v2219_v31 = vld [vmem:[%s3055_s0 + $0xf0] sm:$0xff]   ;;  %v2220_v32 = vld [vmem:[%s3055_s0 + $0x68] sm:$0xff]   ;;  %v2221_v33 = vld [vmem:[%s3055_s0 + $0xf8] sm:$0xff]  }
   0xb   :  { %2112 = vmatpush3.bf16.msra.mxu0 %v2192_v0  ;;  %2152 = vmatpush3.bf16.msra.mxu1 %v2192_v0  ;;  %v2222_v34 = vld [vmem:[%s3055_s0 + $0x70] sm:$0xff]   ;;  %v2223_v35 = vld [vmem:[%s3055_s0 + $0x100] sm:$0xff]   ;;  %v2224_v36 = vld [vmem:[%s3055_s0 + $0x78] sm:$0xff]  }
   0xc   :  { %2039 = vmatprep.mubr.msk.bf16.mxu0 %vm156_vm2, %v2198_v10  ;;  %2079 = vmatprep.mubr.msk.bf16.mxu1 %vm156_vm2, %v2199_v11  ;;  %v2225_v37 = vld [vmem:[%s3055_s0 + $0x108] sm:$0xff]   ;;  %v2226_v38 = vld [vmem:[%s3055_s0 + $0x80] sm:$0xff]   ;;  %v2227_v39 = vld [vmem:[%s3055_s0 + $0x110] sm:$0xff]  }
   0xd   :  { %2113 = vmatprep.subr.bf16.mxu0 %v216_v6  ;;  %2153 = vmatprep.subr.bf16.mxu1 %v216_v6  ;;  %v2228_v40 = vld [vmem:[%s3055_s0 + $0x88] sm:$0xff]   ;;  %v2229_v41 = vld [vmem:[%s3055_s0 + $0x118] sm:$0xff]   ;;  %v2230_v42 = vld [vmem:[%s3055_s0 + $0x120] sm:$0xff]  }
   0xe   :  { %v2231_v43 = vld [vmem:[%s3055_s0 + $0x1b0] sm:$0xff]   ;;  %v2232_v44 = vld [vmem:[%s3055_s0 + $0x128] sm:$0xff]   ;;  %v2233_v45 = vld [vmem:[%s3055_s0 + $0x1b8] sm:$0xff]  }
   0xf   :  { %2114 = vmatpush3.bf16.msra.mxu0 %v216_v6  ;;  %2154 = vmatpush3.bf16.msra.mxu1 %v216_v6  ;;  %v2234_v46 = vld [vmem:[%s3055_s0 + $0x130] sm:$0xff]   ;;  %v2235_v47 = vld [vmem:[%s3055_s0 + $0x1c0] sm:$0xff]   ;;  %v2236_v48 = vld [vmem:[%s3055_s0 + $0x138] sm:$0xff]  }
  0x10   :  { %v2237_v49 = vld [vmem:[%s3055_s0 + $0x1c8] sm:$0xff]   ;;  %v2238_v50 = vld [vmem:[%s3055_s0 + $0x140] sm:$0xff]   ;;  %v2239_v51 = vld [vmem:[%s3055_s0 + $0x1d0] sm:$0xff]  }
  0x11   :  { %v2240_v52 = vld [vmem:[%s3055_s0 + $0x148] sm:$0xff]   ;;  %v2241_v53 = vld [vmem:[%s3055_s0 + $0x1d8] sm:$0xff]   ;;  %v2242_v54 = vld [vmem:[%s3055_s0 + $0x150] sm:$0xff]  }
  0x12   :  { %2040 = vmatmul.mubr.msk.bf16.gmra.mrb[4].mxu0 %vm156_vm2, %v2200_v12  ;;  %2080 = vmatmul.mubr.msk.bf16.gmra.mrb[4].mxu1 %vm156_vm2, %v2201_v13  ;;  %v2243_v55 = vld [vmem:[%s3055_s0 + $0x1e0] sm:$0xff]   ;;  %v2244_v56 = vld [vmem:[%s3055_s0 + $0x158] sm:$0xff]   ;;  %v2245_v57 = vld [vmem:[%s3055_s0 + $0x1e8] sm:$0xff]  }
  0x13   :  { %2043 = vmatprep.mubr.msk.bf16.mxu0 %vm156_vm2, %v2202_v14  ;;  %2083 = vmatprep.mubr.msk.bf16.mxu1 %vm156_vm2, %v2203_v15  ;;  %v2246_v58 = vld [vmem:[%s3055_s0 + $0x160] sm:$0xff]   ;;  %v2247_v59 = vld [vmem:[%s3055_s0 + $0x1f0] sm:$0xff]   ;;  %v2248_v60 = vld [vmem:[%s3055_s0 + $0x168] sm:$0xff]  }
  0x14   :  { %v2249_v61 = vld [vmem:[%s3055_s0 + $0x1f8] sm:$0xff]   ;;  %v2250_v62 = vld [vmem:[%s3055_s0 + $0x170] sm:$0xff]   ;;  %v2251_v63 = vld [vmem:[%s3055_s0 + $0x200] sm:$0xff]  }
  0x15   :  { %v2252_v0 = vld [vmem:[%s3055_s0 + $0x178] sm:$0xff]   ;;  %v2253_v1 = vld [vmem:[%s3055_s0 + $0x208] sm:$0xff]   ;;  %v2254_v2 = vld [vmem:[%s3055_s0 + $0x180] sm:$0xff]  }
  0x16   :  { %v2255_v3 = vld [vmem:[%s3055_s0 + $0x210] sm:$0xff]   ;;  %v2256_v4 = vld [vmem:[%s3055_s0 + $0x188] sm:$0xff]   ;;  %v2257_v5 = vld [vmem:[%s3055_s0 + $0x218] sm:$0xff]  }
  0x17   :  { %v2258_v6 = vld [vmem:[%s3055_s0 + $0x190] sm:$0xff]   ;;  %v2259_v7 = vld [vmem:[%s3055_s0 + $0x220] sm:$0xff]   ;;  %v2260_v8 = vld [vmem:[%s3055_s0 + $0x198] sm:$0xff]  }
  0x18   :  { %v2261_v9 = vld [vmem:[%s3055_s0 + $0x228] sm:$0xff]   ;;  %v2262_v10 = vld [vmem:[%s3055_s0 + $0x1a0] sm:$0xff]   ;;  %v2263_v11 = vld [vmem:[%s3055_s0 + $0x230] sm:$0xff]  }
  0x19   :  { %v2264_v12 = vld [vmem:[%s3055_s0 + $0x1a8] sm:$0xff]   ;;  %v2265_v13 = vld [vmem:[%s3055_s0 + $0x238] sm:$0xff]  }
  0x1a   :  { %2044 = vmatmul.mubr.msk.bf16.gmra.mrb[8].mxu0 %vm156_vm2, %v2204_v16  ;;  %2084 = vmatmul.mubr.msk.bf16.gmra.mrb[8].mxu1 %vm156_vm2, %v2205_v17 }
  0x1b   :  { %2047 = vmatprep.mubr.msk.bf16.mxu0 %vm156_vm2, %v2206_v18  ;;  %2087 = vmatprep.mubr.msk.bf16.mxu1 %vm156_vm2, %v2207_v19 }
  0x22   :  { %2048 = vmatmul.mubr.msk.bf16.gmra.mrb[12].mxu0 %vm156_vm2, %v2208_v20  ;;  %2088 = vmatmul.mubr.msk.bf16.gmra.mrb[12].mxu1 %vm156_vm2, %v2209_v21 }
  0x23   :  { %2051 = vmatprep.mubr.msk.bf16.mxu0 %vm156_vm2, %v2210_v22  ;;  %2091 = vmatprep.mubr.msk.bf16.mxu1 %vm156_vm2, %v2211_v23 }
  0x2a   :  { %2052 = vmatmul.mubr.msk.bf16.gmra.mrb[16].mxu0 %vm156_vm2, %v2212_v24  ;;  %2092 = vmatmul.mubr.msk.bf16.gmra.mrb[16].mxu1 %vm156_vm2, %v2213_v25 }
  0x2b   :  { %2055 = vmatprep.mubr.msk.bf16.mxu0 %vm156_vm2, %v2214_v26  ;;  %2095 = vmatprep.mubr.msk.bf16.mxu1 %vm156_vm2, %v2215_v27 }
  0x32   :  { %2056 = vmatmul.mubr.msk.bf16.gmra.mrb[20].mxu0 %vm156_vm2, %v2216_v28  ;;  %2096 = vmatmul.mubr.msk.bf16.gmra.mrb[20].mxu1 %vm156_vm2, %v2217_v29 }
  0x33   :  { %2059 = vmatprep.mubr.msk.bf16.mxu0 %vm156_vm2, %v2218_v30  ;;  %2099 = vmatprep.mubr.msk.bf16.mxu1 %vm156_vm2, %v2219_v31 }
  0x3a   :  { %2060 = vmatmul.mubr.msk.bf16.gmra.mrb[24].mxu0 %vm156_vm2, %v2220_v32  ;;  %2100 = vmatmul.mubr.msk.bf16.gmra.mrb[24].mxu1 %vm156_vm2, %v2221_v33 }
  0x3b   :  { %2063 = vmatprep.mubr.msk.bf16.mxu0 %vm156_vm2, %v2222_v34  ;;  %2103 = vmatprep.mubr.msk.bf16.mxu1 %vm156_vm2, %v2223_v35 }
  0x42   :  { %2064 = vmatmul.mubr.msk.bf16.gmra.mrb[28].mxu0 %vm156_vm2, %v2224_v36  ;;  %2104 = vmatmul.mubr.msk.bf16.gmra.mrb[28].mxu1 %vm156_vm2, %v2225_v37 }
  0x43   :  { %2067 = vmatprep.mubr.msk.bf16.mxu0 %vm156_vm2, %v2226_v38  ;;  %2107 = vmatprep.mubr.msk.bf16.mxu1 %vm156_vm2, %v2227_v39 }
  0x4a   :  { %2068 = vmatmul.mubr.msk.bf16.gmra.mrb[32].mxu0 %vm156_vm2, %v2228_v40  ;;  %2108 = vmatmul.mubr.msk.bf16.gmra.mrb[32].mxu1 %vm156_vm2, %v2229_v41 }
  0x4b   :  { %2115 = vmatprep.mubr.msk.bf16.mxu0 %vm156_vm2, %v2230_v42  ;;  %2155 = vmatprep.mubr.msk.bf16.mxu1 %vm156_vm2, %v2231_v43 }
  0x52   :  { %2116 = vmatmul.mubr.msk.bf16.vlgmr.msra.gmra.mrb[36].mxu0 %vm156_vm2, %v2232_v44  ;;  %2156 = vmatmul.mubr.msk.bf16.vlgmr.msra.gmra.mrb[36].mxu1 %vm156_vm2, %v2233_v45 }
  0x53   :  { %2119 = vmatprep.mubr.msk.bf16.mxu0 %vm156_vm2, %v2234_v46  ;;  %2159 = vmatprep.mubr.msk.bf16.mxu1 %vm156_vm2, %v2235_v47 }
  0x5a   :  { %2120 = vmatmul.mubr.msk.bf16.gmra.mrb[40].mxu0 %vm156_vm2, %v2236_v48  ;;  %2160 = vmatmul.mubr.msk.bf16.gmra.mrb[40].mxu1 %vm156_vm2, %v2237_v49 }
  0x5b   :  { %2123 = vmatprep.mubr.msk.bf16.mxu0 %vm156_vm2, %v2238_v50  ;;  %2163 = vmatprep.mubr.msk.bf16.mxu1 %vm156_vm2, %v2239_v51 }
  0x62   :  { %2124 = vmatmul.mubr.msk.bf16.gmra.mrb[44].mxu0 %vm156_vm2, %v2240_v52  ;;  %2164 = vmatmul.mubr.msk.bf16.gmra.mrb[44].mxu1 %vm156_vm2, %v2241_v53 }
  0x63   :  { %2127 = vmatprep.mubr.msk.bf16.mxu0 %vm156_vm2, %v2242_v54  ;;  %2167 = vmatprep.mubr.msk.bf16.mxu1 %vm156_vm2, %v2243_v55 }
  0x6a   :  { %2128 = vmatmul.mubr.msk.bf16.gmra.mrb[48].mxu0 %vm156_vm2, %v2244_v56  ;;  %2168 = vmatmul.mubr.msk.bf16.gmra.mrb[48].mxu1 %vm156_vm2, %v2245_v57 }
  0x6b   :  { %2131 = vmatprep.mubr.msk.bf16.mxu0 %vm156_vm2, %v2246_v58  ;;  %2171 = vmatprep.mubr.msk.bf16.mxu1 %vm156_vm2, %v2247_v59 }
  0x72   :  { %2132 = vmatmul.mubr.msk.bf16.gmra.mrb[52].mxu0 %vm156_vm2, %v2248_v60  ;;  %2172 = vmatmul.mubr.msk.bf16.gmra.mrb[52].mxu1 %vm156_vm2, %v2249_v61 }
  0x73   :  { %2135 = vmatprep.mubr.msk.bf16.mxu0 %vm156_vm2, %v2250_v62  ;;  %2175 = vmatprep.mubr.msk.bf16.mxu1 %vm156_vm2, %v2251_v63 }
  0x7a   :  { %2136 = vmatmul.mubr.msk.bf16.gmra.mrb[56].mxu0 %vm156_vm2, %v2252_v0  ;;  %2176 = vmatmul.mubr.msk.bf16.gmra.mrb[56].mxu1 %vm156_vm2, %v2253_v1 }
  0x7b   :  { %2139 = vmatprep.mubr.msk.bf16.mxu0 %vm156_vm2, %v2254_v2  ;;  %2179 = vmatprep.mubr.msk.bf16.mxu1 %vm156_vm2, %v2255_v3 }
  0x82   :  { %2140 = vmatmul.mubr.msk.bf16.gmra.mrb[60].mxu0 %vm156_vm2, %v2256_v4  ;;  %2180 = vmatmul.mubr.msk.bf16.gmra.mrb[60].mxu1 %vm156_vm2, %v2257_v5 }
  0x83   :  { %2143 = vmatprep.mubr.msk.bf16.mxu0 %vm156_vm2, %v2258_v6  ;;  %2183 = vmatprep.mubr.msk.bf16.mxu1 %vm156_vm2, %v2259_v7  ;;  %v2800_v6 = vld [vmem:[%s3056_s2] ss:$0 sm:$0xff] }
  0x8a   :  { %2144 = vmatmul.mubr.msk.bf16.gmra.mrb[64].mxu0 %vm156_vm2, %v2260_v8  ;;  %2184 = vmatmul.mubr.msk.bf16.gmra.mrb[64].mxu1 %vm156_vm2, %v2261_v9 }
  0x8b   :  { %2147 = vmatprep.mubr.msk.bf16.mxu0 %vm156_vm2, %v2262_v10  ;;  %2187 = vmatprep.mubr.msk.bf16.mxu1 %vm156_vm2, %v2263_v11 }
  0x92   :  { %2148 = vmatmul.mubr.msk.bf16.gmra.mrb[68].mxu0 %vm156_vm2, %v2264_v12  ;;  %2188 = vmatmul.mubr.msk.bf16.gmra.mrb[68].mxu1 %vm156_vm2, %v2265_v13 }
  0xdd   :  { %v2581_v14 = vpop.f32.mrb[0].mxu0  ;;  %v2583_v15 = vpop.f32.mrb[0].mxu1 }
  0xde   :  { %v2587_v17 = vpop.f32.mrb[1].mxu0  ;;  %v2589_v18 = vpop.f32.mrb[1].mxu1 }
  0xdf   :  { %v2593_v20 = vpop.f32.mrb[2].mxu0  ;;  %v2595_v21 = vpop.f32.mrb[2].mxu1 }
  0xe0   :  { %v2599_v23 = vpop.f32.mrb[3].mxu0  ;;  %v2601_v24 = vpop.f32.mrb[3].mxu1 }
  0xe5   :  { %v2605_v26 = vpop.f32.mrb[4].mxu0  ;;  %v2607_v27 = vpop.f32.mrb[4].mxu1 }
  0xe6   :  { %v2611_v29 = vpop.f32.mrb[5].mxu0  ;;  %v2613_v30 = vpop.f32.mrb[5].mxu1 }
  0xe7   :  { %v2617_v32 = vpop.f32.mrb[6].mxu0  ;;  %v2619_v33 = vpop.f32.mrb[6].mxu1 }
  0xe8   :  { %v2623_v35 = vpop.f32.mrb[7].mxu0  ;;  %v2625_v36 = vpop.f32.mrb[7].mxu1 }
  0xed   :  { %v2629_v38 = vpop.f32.mrb[8].mxu0  ;;  %v2631_v39 = vpop.f32.mrb[8].mxu1 }
  0xee   :  { %v2635_v41 = vpop.f32.mrb[9].mxu0  ;;  %v2637_v42 = vpop.f32.mrb[9].mxu1 }
  0xef   :  { %v2641_v44 = vpop.f32.mrb[10].mxu0  ;;  %v2643_v45 = vpop.f32.mrb[10].mxu1 }
  0xf0   :  { %v2647_v47 = vpop.f32.mrb[11].mxu0  ;;  %v2649_v48 = vpop.f32.mrb[11].mxu1 }
  0xf5   :  { %v2653_v50 = vpop.f32.mrb[12].mxu0  ;;  %v2655_v51 = vpop.f32.mrb[12].mxu1 }
  0xf6   :  { %v2659_v53 = vpop.f32.mrb[13].mxu0  ;;  %v2661_v54 = vpop.f32.mrb[13].mxu1 }
  0xf7   :  { %v2665_v56 = vpop.f32.mrb[14].mxu0  ;;  %v2667_v57 = vpop.f32.mrb[14].mxu1 }
  0xf8   :  { %v2671_v59 = vpop.f32.mrb[15].mxu0  ;;  %v2673_v60 = vpop.f32.mrb[15].mxu1 }
  0xfd   :  { %v2677_v62 = vpop.f32.mrb[16].mxu0  ;;  %v2679_v63 = vpop.f32.mrb[16].mxu1 }
  0xfe   :  { %v2683_v1 = vpop.f32.mrb[17].mxu0  ;;  %v2685_v2 = vpop.f32.mrb[17].mxu1 }
  0xff   :  { %v2689_v4 = vpop.f32.mrb[18].mxu0  ;;  %v2691_v5 = vpop.f32.mrb[18].mxu1 }
 0x100   :  { %v2695_v7 = vpop.f32.mrb[19].mxu0  ;;  %v2697_v8 = vpop.f32.mrb[19].mxu1 }
 0x105   :  { %v2701_v10 = vpop.f32.mrb[20].mxu0  ;;  %v2703_v11 = vpop.f32.mrb[20].mxu1 }
 0x106   :  { %v2707_v13 = vpop.f32.mrb[21].mxu0  ;;  %v2709_v3 = vpop.f32.mrb[21].mxu1 }
 0x107   :  { %v2713_v0 = vpop.f32.mrb[22].mxu0  ;;  %v2715_v61 = vpop.f32.mrb[22].mxu1 }
 0x108   :  { %v2719_v58 = vpop.f32.mrb[23].mxu0  ;;  %v2721_v55 = vpop.f32.mrb[23].mxu1 }
 0x109   :  { %3083 = vst [vmem:[#allocation2_spill] sm:$0xff] %v2721_v55  ;;  %v3110_v55 = vmax.f32 %v2593_v20, %v2595_v21 }
 0x10d   :  { %v2725_v52 = vpop.f32.mrb[24].mxu0  ;;  %v2727_v49 = vpop.f32.mrb[24].mxu1 }
 0x10e   :  { %3084 = vst [vmem:[#allocation3_spill] sm:$0xff] %v2725_v52  ;;  %3085 = vst [vmem:[#allocation4_spill] sm:$0xff] %v2727_v49  ;;  %v2731_v46 = vpop.f32.mrb[25].mxu0  ;;  %v2733_v43 = vpop.f32.mrb[25].mxu1 }
 0x10f   :  { %3086 = vst [vmem:[#allocation5_spill] sm:$0xff] %v2731_v46  ;;  %3087 = vst [vmem:[#allocation6_spill] sm:$0xff] %v2733_v43  ;;  %v2737_v40 = vpop.f32.mrb[26].mxu0  ;;  %v2739_v37 = vpop.f32.mrb[26].mxu1 }
 0x110   :  { %3088 = vst [vmem:[#allocation7_spill] sm:$0xff] %v2737_v40  ;;  %3089 = vst [vmem:[#allocation8_spill] sm:$0xff] %v2739_v37  ;;  %v2743_v34 = vpop.f32.mrb[27].mxu0  ;;  %v2745_v31 = vpop.f32.mrb[27].mxu1 }
 0x111   :  { %3090 = vst [vmem:[#allocation9_spill] sm:$0xff] %v2743_v34  ;;  %3091 = vst [vmem:[#allocation10_spill] sm:$0xff] %v2745_v31 }
 0x115   :  { %v2749_v28 = vpop.f32.mrb[28].mxu0  ;;  %v2751_v25 = vpop.f32.mrb[28].mxu1 }
 0x116   :  { %3092 = vst [vmem:[#allocation11_spill] sm:$0xff] %v2749_v28  ;;  %3093 = vst [vmem:[#allocation12_spill] sm:$0xff] %v2751_v25  ;;  %v2755_v22 = vpop.f32.mrb[29].mxu0  ;;  %v2757_v19 = vpop.f32.mrb[29].mxu1 }
 0x117   :  { %3094 = vst [vmem:[#allocation13_spill] sm:$0xff] %v2755_v22  ;;  %3095 = vst [vmem:[#allocation14_spill] sm:$0xff] %v2757_v19  ;;  %v2761_v16 = vpop.f32.mrb[30].mxu0  ;;  %v2763_v37 = vpop.f32.mrb[30].mxu1 }
 0x118   :  { %3096 = vst [vmem:[#allocation15_spill] sm:$0xff] %v2761_v16  ;;  %3097 = vst [vmem:[#allocation16_spill] sm:$0xff] %v2763_v37  ;;  %v2767_v31 = vpop.f32.mrb[31].mxu0  ;;  %v2769_v34 = vpop.f32.mrb[31].mxu1 }
 0x119   :  { %3098 = vst [vmem:[#allocation17_spill] sm:$0xff] %v2767_v31  ;;  %3099 = vst [vmem:[#allocation18_spill] sm:$0xff] %v2769_v34 }
 0x11d   :  { %v2773_v25 = vpop.f32.mrb[32].mxu0  ;;  %v2775_v28 = vpop.f32.mrb[32].mxu1 }
 0x11e   :  { %3100 = vst [vmem:[#allocation19_spill] sm:$0xff] %v2773_v25  ;;  %3101 = vst [vmem:[#allocation20_spill] sm:$0xff] %v2775_v28  ;;  %v2779_v19 = vpop.f32.mrb[33].mxu0  ;;  %v2781_v22 = vpop.f32.mrb[33].mxu1 }
 0x11f   :  { %3102 = vst [vmem:[#allocation21_spill] sm:$0xff] %v2779_v19  ;;  %3103 = vst [vmem:[#allocation22_spill] sm:$0xff] %v2781_v22  ;;  %v2785_v37 = vpop.f32.mrb[34].mxu0  ;;  %v2787_v16 = vpop.f32.mrb[34].mxu1 }
 0x120   :  { %3104 = vst [vmem:[#allocation23_spill] sm:$0xff] %v2785_v37  ;;  %3105 = vst [vmem:[#allocation24_spill] sm:$0xff] %v2787_v16  ;;  %v2791_v34 = vpop.f32.mrb[35].mxu0  ;;  %v2793_v31 = vpop.f32.mrb[35].mxu1  ;;  %v3108_v16 = vmax.f32 %v2581_v14, %v2583_v15  ;;  %v3111_v14 = vmax.f32 %v2599_v23, %v2601_v24 }
 0x121   :  { %3106 = vst [vmem:[#allocation25_spill] sm:$0xff] %v2791_v34  ;;  %3107 = vst [vmem:[#allocation26_spill] sm:$0xff] %v2793_v31 }
 0x125   :  { %v2117_v28 = vpop.f32.mrb[36].mxu0  ;;  %v2157_v25 = vpop.f32.mrb[36].mxu1 }
 0x126   :  { %v1507_v40 = vmax.f32 %v2117_v28, %v2157_v25  ;;  %v968_v43 = vpop.f32.mrb[37].mxu0  ;;  %v1326_v46 = vpop.f32.mrb[37].mxu1  ;;  %v3109_v25 = vmax.f32 %v2587_v17, %v2589_v18 }
 0x127   :  { %v1505_v22 = vmax.f32 %v968_v43, %v1326_v46  ;;  %v2118_v19 = vpop.f32.mrb[38].mxu0  ;;  %v2158_v9 = vpop.f32.mrb[38].mxu1 }
 0x128   :  { %v1543_v37 = vmax.f32 %v3108_v16, %v1507_v40  ;;  %v1508_v49 = vmax.f32 %v2118_v19, %v2158_v9  ;;  %v971_v52 = vpop.f32.mrb[39].mxu0  ;;  %v1329_v12 = vpop.f32.mrb[39].mxu1 }
 0x129   :  { %v1541_v28 = vmax.f32 %v3109_v25, %v1505_v22  ;;  %v1506_v31 = vmax.f32 %v971_v52, %v1329_v12  ;;  %v3112_v52 = vmax.f32 %v2605_v26, %v2607_v27  ;;  %v3115_v27 = vmax.f32 %v2623_v35, %v2625_v36 }
 0x12a   :  { %v1586_v34 = vadd.f32 %v2800_v6, %v1543_v37  ;;  %v1544_v43 = vmax.f32 %v3110_v55, %v1508_v49 }
 0x12b   :  { %v1584_v46 = vadd.f32 %v2800_v6, %v1541_v28  ;;  %v1542_v15 = vmax.f32 %v3111_v14, %v1506_v31  ;;  %v3113_v28 = vmax.f32 %v2611_v29, %v2613_v30 }
 0x12c   :  { %v1622_v16 = vmax.f32 %v1586_v34, 0.0  ;;  %v1587_v19 = vadd.f32 %v2800_v6, %v1544_v43 }
 0x12d   :  { %v1620_v40 = vmax.f32 %v1584_v46, 0.0  ;;  %v1585_v17 = vadd.f32 %v2800_v6, %v1542_v15  ;;  %v2121_v18 = vpop.f32.mrb[40].mxu0  ;;  %v2161_v22 = vpop.f32.mrb[40].mxu1  ;;  %v3114_v15 = vmax.f32 %v2617_v32, %v2619_v33 }
 0x12e   :  { %1658 = vst [vmem:[%s3057_s3 + $0x10] sm:$0xff] %v1622_v16  ;;  %v1623_v20 = vmax.f32 %v1587_v19, 0.0  ;;  %v1511_v21 = vmax.f32 %v2121_v18, %v2161_v22  ;;  %v984_v37 = vpop.f32.mrb[41].mxu0  ;;  %v1342_v49 = vpop.f32.mrb[41].mxu1 }
 0x12f   :  { %1656 = vst [vmem:[%s3057_s3] sm:$0xff] %v1620_v40  ;;  %v1621_v23 = vmax.f32 %v1585_v17, 0.0  ;;  %v1509_v24 = vmax.f32 %v984_v37, %v1342_v49  ;;  %v2122_v31 = vpop.f32.mrb[42].mxu0  ;;  %v2162_v34 = vpop.f32.mrb[42].mxu1 }
 0x130   :  { %1659 = vst [vmem:[%s3057_s3 + $0x18] sm:$0xff] %v1623_v20  ;;  %v1547_v55 = vmax.f32 %v3112_v52, %v1511_v21  ;;  %v1512_v9 = vmax.f32 %v2122_v31, %v2162_v34  ;;  %v987_v12 = vpop.f32.mrb[43].mxu0  ;;  %v1345_v25 = vpop.f32.mrb[43].mxu1 }
 0x131   :  { %1657 = vst [vmem:[%s3057_s3 + $0x8] sm:$0xff] %v1621_v23  ;;  %v1545_v43 = vmax.f32 %v3113_v28, %v1509_v24  ;;  %v1510_v46 = vmax.f32 %v987_v12, %v1345_v25  ;;  %v3116_v23 = vmax.f32 %v2629_v38, %v2631_v39  ;;  %v3118_v28 = vmax.f32 %v2641_v44, %v2643_v45 }
 0x132   :  { %v1590_v14 = vadd.f32 %v2800_v6, %v1547_v55  ;;  %v1548_v16 = vmax.f32 %v3114_v15, %v1512_v9  ;;  %v3117_v55 = vmax.f32 %v2635_v41, %v2637_v42  ;;  %v3119_v39 = vmax.f32 %v2647_v47, %v2649_v48 }
 0x133   :  { %v1588_v26 = vadd.f32 %v2800_v6, %v1545_v43  ;;  %v1546_v19 = vmax.f32 %v3115_v27, %v1510_v46 }
 0x134   :  { %v1626_v40 = vmax.f32 %v1590_v14, 0.0  ;;  %v1591_v17 = vadd.f32 %v2800_v6, %v1548_v16 }
 0x135   :  { %v1624_v18 = vmax.f32 %v1588_v26, 0.0  ;;  %v1589_v29 = vadd.f32 %v2800_v6, %v1546_v19  ;;  %v2125_v30 = vpop.f32.mrb[44].mxu0  ;;  %v2165_v22 = vpop.f32.mrb[44].mxu1 }
 0x136   :  { %1662 = vst [vmem:[%s3057_s3 + $0x30] sm:$0xff] %v1626_v40  ;;  %v1627_v32 = vmax.f32 %v1591_v17, 0.0  ;;  %v1515_v33 = vmax.f32 %v2125_v30, %v2165_v22  ;;  %v1000_v20 = vpop.f32.mrb[45].mxu0  ;;  %v1358_v21 = vpop.f32.mrb[45].mxu1 }
 0x137   :  { %1660 = vst [vmem:[%s3057_s3 + $0x20] sm:$0xff] %v1624_v18  ;;  %v1625_v35 = vmax.f32 %v1589_v29, 0.0  ;;  %v1513_v36 = vmax.f32 %v1000_v20, %v1358_v21  ;;  %v2126_v37 = vpop.f32.mrb[46].mxu0  ;;  %v2166_v49 = vpop.f32.mrb[46].mxu1  ;;  %v3120_v18 = vmax.f32 %v2653_v50, %v2655_v51  ;;  %v3123_v51 = vmax.f32 %v2671_v59, %v2673_v60 }
 0x138   :  { %1663 = vst [vmem:[%s3057_s3 + $0x38] sm:$0xff] %v1627_v32  ;;  %v1551_v24 = vmax.f32 %v3116_v23, %v1515_v33  ;;  %v1516_v31 = vmax.f32 %v2126_v37, %v2166_v49  ;;  %v1003_v34 = vpop.f32.mrb[47].mxu0  ;;  %v1361_v52 = vpop.f32.mrb[47].mxu1  ;;  %v3121_v33 = vmax.f32 %v2659_v53, %v2661_v54 }
 0x139   :  { %1661 = vst [vmem:[%s3057_s3 + $0x28] sm:$0xff] %v1625_v35  ;;  %v1549_v9 = vmax.f32 %v3117_v55, %v1513_v36  ;;  %v1514_v12 = vmax.f32 %v1003_v34, %v1361_v52  ;;  %v3122_v36 = vmax.f32 %v2665_v56, %v2667_v57 }
 0x13a   :  { %v1594_v25 = vadd.f32 %v2800_v6, %v1551_v24  ;;  %v1552_v43 = vmax.f32 %v3118_v28, %v1516_v31 }
 0x13b   :  { %v1592_v38 = vadd.f32 %v2800_v6, %v1549_v9  ;;  %v1550_v46 = vmax.f32 %v3119_v39, %v1514_v12 }
 0x13c   :  { %v1630_v14 = vmax.f32 %v1594_v25, 0.0  ;;  %v1595_v15 = vadd.f32 %v2800_v6, %v1552_v43  ;;  %v3124_v25 = vmax.f32 %v2677_v62, %v2679_v63  ;;  %v3127_v63 = vmax.f32 %v2695_v7, %v2697_v8 }
 0x13d   :  { %v1628_v16 = vmax.f32 %v1592_v38, 0.0  ;;  %v1593_v41 = vadd.f32 %v2800_v6, %v1550_v46  ;;  %v2129_v42 = vpop.f32.mrb[48].mxu0  ;;  %v2169_v26 = vpop.f32.mrb[48].mxu1  ;;  %v3125_v46 = vmax.f32 %v2683_v1, %v2685_v2 }
 0x13e   :  { %1666 = vst [vmem:[%s3057_s3 + $0x50] sm:$0xff] %v1630_v14  ;;  %v1631_v44 = vmax.f32 %v1595_v15, 0.0  ;;  %v1519_v45 = vmax.f32 %v2129_v42, %v2169_v26  ;;  %v1016_v27 = vpop.f32.mrb[49].mxu0  ;;  %v1374_v19 = vpop.f32.mrb[49].mxu1 }
 0x13f   :  { %1664 = vst [vmem:[%s3057_s3 + $0x40] sm:$0xff] %v1628_v16  ;;  %v1629_v47 = vmax.f32 %v1593_v41, 0.0  ;;  %v1517_v48 = vmax.f32 %v1016_v27, %v1374_v19  ;;  %v2130_v40 = vpop.f32.mrb[50].mxu0  ;;  %v2170_v17 = vpop.f32.mrb[50].mxu1  ;;  %v3126_v41 = vmax.f32 %v2689_v4, %v2691_v5 }
 0x140   :  { %1667 = vst [vmem:[%s3057_s3 + $0x58] sm:$0xff] %v1631_v44  ;;  %v1555_v29 = vmax.f32 %v3120_v18, %v1519_v45  ;;  %v1520_v30 = vmax.f32 %v2130_v40, %v2170_v17  ;;  %v1019_v22 = vpop.f32.mrb[51].mxu0  ;;  %v1377_v32 = vpop.f32.mrb[51].mxu1  ;;  %v3128_v18 = vmax.f32 %v2701_v10, %v2703_v11  ;;  %v3131_v11 = vld [vmem:[#allocation2_spill] sm:$0xff] }
 0x141   :  { %1665 = vst [vmem:[%s3057_s3 + $0x48] sm:$0xff] %v1629_v47  ;;  %v1553_v20 = vmax.f32 %v3121_v33, %v1517_v48  ;;  %v1518_v21 = vmax.f32 %v1019_v22, %v1377_v32  ;;  %v3129_v33 = vmax.f32 %v2707_v13, %v2709_v3 }
 0x142   :  { %v1598_v35 = vadd.f32 %v2800_v6, %v1555_v29  ;;  %v1556_v37 = vmax.f32 %v3122_v36, %v1520_v30  ;;  %v3130_v36 = vmax.f32 %v2713_v0, %v2715_v61 }
 0x143   :  { %v1596_v50 = vadd.f32 %v2800_v6, %v1553_v20  ;;  %v1554_v49 = vmax.f32 %v3123_v51, %v1518_v21 }
 0x144   :  { %v1634_v23 = vmax.f32 %v1598_v35, 0.0  ;;  %v1599_v24 = vadd.f32 %v2800_v6, %v1556_v37 }
 0x145   :  { %v1632_v31 = vmax.f32 %v1596_v50, 0.0  ;;  %v1597_v53 = vadd.f32 %v2800_v6, %v1554_v49  ;;  %v2133_v54 = vpop.f32.mrb[52].mxu0  ;;  %v2173_v34 = vpop.f32.mrb[52].mxu1  ;;  %v3132_v50 = vmax.f32 %v2719_v58, %v3131_v11 }
 0x146   :  { %1670 = vst [vmem:[%s3057_s3 + $0x70] sm:$0xff] %v1634_v23  ;;  %v1635_v56 = vmax.f32 %v1599_v24, 0.0  ;;  %v1523_v57 = vmax.f32 %v2133_v54, %v2173_v34  ;;  %v1032_v52 = vpop.f32.mrb[53].mxu0  ;;  %v1390_v55 = vpop.f32.mrb[53].mxu1 }
 0x147   :  { %1668 = vst [vmem:[%s3057_s3 + $0x60] sm:$0xff] %v1632_v31  ;;  %v1633_v59 = vmax.f32 %v1597_v53, 0.0  ;;  %v1521_v60 = vmax.f32 %v1032_v52, %v1390_v55  ;;  %v2134_v9 = vpop.f32.mrb[54].mxu0  ;;  %v2174_v12 = vpop.f32.mrb[54].mxu1  ;;  %v3133_v52 = vld [vmem:[#allocation3_spill] sm:$0xff]  ;;  %v3134_v55 = vld [vmem:[#allocation4_spill] sm:$0xff] }
 0x148   :  { %1671 = vst [vmem:[%s3057_s3 + $0x78] sm:$0xff] %v1635_v56  ;;  %v1559_v28 = vmax.f32 %v3124_v25, %v1523_v57  ;;  %v1524_v43 = vmax.f32 %v2134_v9, %v2174_v12  ;;  %v1035_v38 = vpop.f32.mrb[55].mxu0  ;;  %v1393_v39 = vpop.f32.mrb[55].mxu1 }
 0x149   :  { %1669 = vst [vmem:[%s3057_s3 + $0x68] sm:$0xff] %v1633_v59  ;;  %v1557_v14 = vmax.f32 %v3125_v46, %v1521_v60  ;;  %v1522_v15 = vmax.f32 %v1035_v38, %v1393_v39  ;;  %v3135_v59 = vmax.f32 %v3133_v52, %v3134_v55 }
 0x14a   :  { %v1602_v16 = vadd.f32 %v2800_v6, %v1559_v28  ;;  %v1560_v42 = vmax.f32 %v3126_v41, %v1524_v43  ;;  %v3136_v28 = vld [vmem:[#allocation5_spill] sm:$0xff]  ;;  %v3137_v43 = vld [vmem:[#allocation6_spill] sm:$0xff] }
 0x14b   :  { %v1600_v62 = vadd.f32 %v2800_v6, %v1557_v14  ;;  %v1558_v26 = vmax.f32 %v3127_v63, %v1522_v15  ;;  %v3138_v38 = vmax.f32 %v3136_v28, %v3137_v43  ;;  %v3139_v15 = vld [vmem:[#allocation7_spill] sm:$0xff]  ;;  %v3142_v63 = vld [vmem:[#allocation9_spill] sm:$0xff] }
 0x14c   :  { %v1638_v44 = vmax.f32 %v1602_v16, 0.0  ;;  %v1603_v45 = vadd.f32 %v2800_v6, %v1560_v42  ;;  %v3140_v16 = vld [vmem:[#allocation8_spill] sm:$0xff] }
 0x14d   :  { %v1636_v27 = vmax.f32 %v1600_v62, 0.0  ;;  %v1601_v1 = vadd.f32 %v2800_v6, %v1558_v26  ;;  %v2137_v2 = vpop.f32.mrb[56].mxu0  ;;  %v2177_v19 = vpop.f32.mrb[56].mxu1  ;;  %v3141_v41 = vmax.f32 %v3139_v15, %v3140_v16  ;;  %v3143_v26 = vld [vmem:[#allocation10_spill] sm:$0xff] }
 0x14e   :  { %1674 = vst [vmem:[%s3057_s3 + $0x90] sm:$0xff] %v1638_v44  ;;  %v1639_v4 = vmax.f32 %v1603_v45, 0.0  ;;  %v1527_v5 = vmax.f32 %v2137_v2, %v2177_v19  ;;  %v1048_v47 = vpop.f32.mrb[57].mxu0  ;;  %v1406_v48 = vpop.f32.mrb[57].mxu1  ;;  %v3144_v44 = vmax.f32 %v3142_v63, %v3143_v26 }
 0x14f   :  { %1672 = vst [vmem:[%s3057_s3 + $0x80] sm:$0xff] %v1636_v27  ;;  %v1637_v7 = vmax.f32 %v1601_v1, 0.0  ;;  %v1525_v8 = vmax.f32 %v1048_v47, %v1406_v48  ;;  %v2138_v40 = vpop.f32.mrb[58].mxu0  ;;  %v2178_v17 = vpop.f32.mrb[58].mxu1 }
 0x150   :  { %1675 = vst [vmem:[%s3057_s3 + $0x98] sm:$0xff] %v1639_v4  ;;  %v1563_v29 = vmax.f32 %v3128_v18, %v1527_v5  ;;  %v1528_v30 = vmax.f32 %v2138_v40, %v2178_v17  ;;  %v1051_v22 = vpop.f32.mrb[59].mxu0  ;;  %v1409_v32 = vpop.f32.mrb[59].mxu1 }
 0x151   :  { %1673 = vst [vmem:[%s3057_s3 + $0x88] sm:$0xff] %v1637_v7  ;;  %v1561_v20 = vmax.f32 %v3129_v33, %v1525_v8  ;;  %v1526_v21 = vmax.f32 %v1051_v22, %v1409_v32  ;;  %v3146_v22 = vld [vmem:[#allocation12_spill] sm:$0xff] }
 0x152   :  { %v1606_v35 = vadd.f32 %v2800_v6, %v1563_v29  ;;  %v1564_v37 = vmax.f32 %v3130_v36, %v1528_v30  ;;  %v3145_v30 = vld [vmem:[#allocation11_spill] sm:$0xff]  ;;  %v3148_v36 = vld [vmem:[#allocation13_spill] sm:$0xff] }
 0x153   :  { %v1604_v10 = vadd.f32 %v2800_v6, %v1561_v20  ;;  %v1562_v51 = vmax.f32 %v3132_v50, %v1526_v21  ;;  %v3147_v32 = vmax.f32 %v3145_v30, %v3146_v22 }
 0x154   :  { %v1642_v49 = vmax.f32 %v1606_v35, 0.0  ;;  %v1607_v23 = vadd.f32 %v2800_v6, %v1564_v37  ;;  %v3149_v37 = vld [vmem:[#allocation14_spill] sm:$0xff] }
 0x155   :  { %v1640_v24 = vmax.f32 %v1604_v10, 0.0  ;;  %v1605_v3 = vadd.f32 %v2800_v6, %v1562_v51  ;;  %v2141_v13 = vpop.f32.mrb[60].mxu0  ;;  %v2181_v31 = vpop.f32.mrb[60].mxu1  ;;  %v3150_v10 = vmax.f32 %v3148_v36, %v3149_v37 }
 0x156   :  { %1678 = vst [vmem:[%s3057_s3 + $0xb0] sm:$0xff] %v1642_v49  ;;  %v1643_v61 = vmax.f32 %v1607_v23, 0.0  ;;  %v1531_v0 = vmax.f32 %v2141_v13, %v2181_v31  ;;  %v1064_v53 = vpop.f32.mrb[61].mxu0  ;;  %v1422_v54 = vpop.f32.mrb[61].mxu1  ;;  %v3151_v49 = vld [vmem:[#allocation15_spill] sm:$0xff]  ;;  %v3152_v23 = vld [vmem:[#allocation16_spill] sm:$0xff] }
 0x157   :  { %1676 = vst [vmem:[%s3057_s3 + $0xa0] sm:$0xff] %v1640_v24  ;;  %v1641_v58 = vmax.f32 %v1605_v3, 0.0  ;;  %v1529_v34 = vmax.f32 %v1064_v53, %v1422_v54  ;;  %v2142_v56 = vpop.f32.mrb[62].mxu0  ;;  %v2182_v57 = vpop.f32.mrb[62].mxu1  ;;  %v3153_v24 = vmax.f32 %v3151_v49, %v3152_v23  ;;  %v3154_v31 = vld [vmem:[#allocation17_spill] sm:$0xff] }
 0x158   :  { %1679 = vst [vmem:[%s3057_s3 + $0xb8] sm:$0xff] %v1643_v61  ;;  %v1567_v60 = vmax.f32 %v3135_v59, %v1531_v0  ;;  %v1532_v9 = vmax.f32 %v2142_v56, %v2182_v57  ;;  %v1067_v12 = vpop.f32.mrb[63].mxu0  ;;  %v1425_v25 = vpop.f32.mrb[63].mxu1  ;;  %v3155_v61 = vld [vmem:[#allocation18_spill] sm:$0xff] }
 0x159   :  { %1677 = vst [vmem:[%s3057_s3 + $0xa8] sm:$0xff] %v1641_v58  ;;  %v1565_v39 = vmax.f32 %v3138_v38, %v1529_v34  ;;  %v1530_v46 = vmax.f32 %v1067_v12, %v1425_v25  ;;  %v3156_v0 = vmax.f32 %v3154_v31, %v3155_v61  ;;  %v3157_v38 = vld [vmem:[#allocation19_spill] sm:$0xff] }
 0x15a   :  { %v1610_v14 = vadd.f32 %v2800_v6, %v1567_v60  ;;  %v1568_v42 = vmax.f32 %v3141_v41, %v1532_v9 }
 0x15b   :  { %v1608_v62 = vadd.f32 %v2800_v6, %v1565_v39  ;;  %v1566_v45 = vmax.f32 %v3144_v44, %v1530_v46  ;;  %v3158_v39 = vld [vmem:[#allocation20_spill] sm:$0xff] }
 0x15c   :  { %v1646_v27 = vmax.f32 %v1610_v14, 0.0  ;;  %v1611_v1 = vadd.f32 %v2800_v6, %v1568_v42  ;;  %v3159_v46 = vmax.f32 %v3157_v38, %v3158_v39  ;;  %v3160_v42 = vld [vmem:[#allocation21_spill] sm:$0xff] }
 0x15d   :  { %v1644_v2 = vmax.f32 %v1608_v62, 0.0  ;;  %v1609_v19 = vadd.f32 %v2800_v6, %v1566_v45  ;;  %v2145_v4 = vpop.f32.mrb[64].mxu0  ;;  %v2185_v5 = vpop.f32.mrb[64].mxu1  ;;  %v3161_v62 = vld [vmem:[#allocation22_spill] sm:$0xff] }
 0x15e   :  { %1682 = vst [vmem:[%s3057_s3 + $0xd0] sm:$0xff] %v1646_v27  ;;  %v1647_v47 = vmax.f32 %v1611_v1, 0.0  ;;  %v1535_v48 = vmax.f32 %v2145_v4, %v2185_v5  ;;  %v1080_v7 = vpop.f32.mrb[65].mxu0  ;;  %v1438_v8 = vpop.f32.mrb[65].mxu1  ;;  %v3162_v63 = vmax.f32 %v3160_v42, %v3161_v62  ;;  %v3163_v27 = vld [vmem:[#allocation23_spill] sm:$0xff]  ;;  %v3164_v1 = vld [vmem:[#allocation24_spill] sm:$0xff] }
 0x15f   :  { %1680 = vst [vmem:[%s3057_s3 + $0xc0] sm:$0xff] %v1644_v2  ;;  %v1645_v40 = vmax.f32 %v1609_v19, 0.0  ;;  %v1533_v17 = vmax.f32 %v1080_v7, %v1438_v8  ;;  %v2146_v18 = vpop.f32.mrb[66].mxu0  ;;  %v2186_v29 = vpop.f32.mrb[66].mxu1  ;;  %v3165_v2 = vmax.f32 %v3163_v27, %v3164_v1  ;;  %v3166_v5 = vld [vmem:[#allocation25_spill] sm:$0xff] }
 0x160   :  { %1683 = vst [vmem:[%s3057_s3 + $0xd8] sm:$0xff] %v1647_v47  ;;  %v1571_v33 = vmax.f32 %v3147_v32, %v1535_v48  ;;  %v1536_v20 = vmax.f32 %v2146_v18, %v2186_v29  ;;  %v1083_v21 = vpop.f32.mrb[67].mxu0  ;;  %v1441_v35 = vpop.f32.mrb[67].mxu1  ;;  %v3167_v47 = vld [vmem:[#allocation26_spill] sm:$0xff] }
 0x161   :  { %1681 = vst [vmem:[%s3057_s3 + $0xc8] sm:$0xff] %v1645_v40  ;;  %v1569_v11 = vmax.f32 %v3150_v10, %v1533_v17  ;;  %v1534_v50 = vmax.f32 %v1083_v21, %v1441_v35  ;;  %v3168_v48 = vmax.f32 %v3166_v5, %v3167_v47 }
 0x162   :  { %v1614_v51 = vadd.f32 %v2800_v6, %v1571_v33  ;;  %v1572_v3 = vmax.f32 %v3153_v24, %v1536_v20 }
 0x163   :  { %v1612_v13 = vadd.f32 %v2800_v6, %v1569_v11  ;;  %v1570_v53 = vmax.f32 %v3156_v0, %v1534_v50 }
 0x164   :  { %v1650_v54 = vmax.f32 %v1614_v51, 0.0  ;;  %v1615_v58 = vadd.f32 %v2800_v6, %v1572_v3 }
 0x165   :  { %v1648_v34 = vmax.f32 %v1612_v13, 0.0  ;;  %v1613_v56 = vadd.f32 %v2800_v6, %v1570_v53  ;;  %v2149_v57 = vpop.f32.mrb[68].mxu0  ;;  %v2189_v52 = vpop.f32.mrb[68].mxu1 }
 0x166   :  { %1686 = vst [vmem:[%s3057_s3 + $0xf0] sm:$0xff] %v1650_v54  ;;  %v1651_v55 = vmax.f32 %v1615_v58, 0.0  ;;  %v1539_v59 = vmax.f32 %v2149_v57, %v2189_v52  ;;  %v1096_v60 = vpop.f32.mrb[69].mxu0  ;;  %v1454_v9 = vpop.f32.mrb[69].mxu1 }
 0x167   :  { %1684 = vst [vmem:[%s3057_s3 + $0xe0] sm:$0xff] %v1648_v34  ;;  %v1649_v12 = vmax.f32 %v1613_v56, 0.0  ;;  %v1537_v25 = vmax.f32 %v1096_v60, %v1454_v9  ;;  %v2150_v28 = vpop.f32.mrb[70].mxu0  ;;  %v2190_v43 = vpop.f32.mrb[70].mxu1 }
 0x168   :  { %1687 = vst [vmem:[%s3057_s3 + $0xf8] sm:$0xff] %v1651_v55  ;;  %v1575_v14 = vmax.f32 %v3159_v46, %v1539_v59  ;;  %v1540_v15 = vmax.f32 %v2150_v28, %v2190_v43  ;;  %v1099_v16 = vpop.f32.mrb[71].mxu0  ;;  %v1457_v41 = vpop.f32.mrb[71].mxu1 }
 0x169   :  { %1685 = vst [vmem:[%s3057_s3 + $0xe8] sm:$0xff] %v1649_v12  ;;  %v1573_v26 = vmax.f32 %v3162_v63, %v1537_v25  ;;  %v1538_v44 = vmax.f32 %v1099_v16, %v1457_v41 }
 0x16a   :  { %v1618_v45 = vadd.f32 %v2800_v6, %v1575_v14  ;;  %v1576_v19 = vmax.f32 %v3165_v2, %v1540_v15 }
 0x16b   :  { %v1616_v4 = vadd.f32 %v2800_v6, %v1573_v26  ;;  %v1574_v7 = vmax.f32 %v3168_v48, %v1538_v44 }
 0x16c   :  { %v1654_v8 = vmax.f32 %v1618_v45, 0.0  ;;  %v1619_v40 = vadd.f32 %v2800_v6, %v1576_v19 }
 0x16d   :  { %v1652_v17 = vmax.f32 %v1616_v4, 0.0  ;;  %v1617_v18 = vadd.f32 %v2800_v6, %v1574_v7 }
 0x16e   :  { %1690 = vst [vmem:[%s3057_s3 + $0x110] sm:$0xff] %v1654_v8  ;;  %v1655_v29 = vmax.f32 %v1619_v40, 0.0 }
 0x16f   :  { %1688 = vst [vmem:[%s3057_s3 + $0x100] sm:$0xff] %v1652_v17  ;;  %v1653_v30 = vmax.f32 %v1617_v18, 0.0 }
 0x170   :  { %1691 = vst [vmem:[%s3057_s3 + $0x118] sm:$0xff] %v1655_v29 }
 0x171   :  { %1689 = vst [vmem:[%s3057_s3 + $0x108] sm:$0xff] %v1653_v30 }

// kernel: net_forward.4
= control target key start
LH: loop header
LB: loop body
LE: loop exit
PB: predicated region body
PF: predicated region fallthrough
CT: control target
= control target key end

     0   :  { %vm164_vm0 = vcmask 998400   ;;  %vm171_vm1 = vcmask 1044480   ;;  %s887_s1 = inlined_call_operand.vmem [shape: bf16[250,128], index: 1, kind: input, shape index: {}]   ;;  %s888_s0 = inlined_call_operand.vmem [shape: bf16[4,32,250], index: 0, kind: input, shape index: {}]   ;;  %s889_s2 = inlined_call_operand.vmem [shape: f32[1,128], index: 2, kind: input, shape index: {}]   ;;  %s890_s3 = inlined_call_operand.vmem [shape: f32[32,128], index: 3, kind: output, shape index: {}]  }
   0x1   :  { %v662_v0 = vld [vmem:[%s887_s1 + $0x40] sm:$0xff]   ;;  %v664_v2 = vld [vmem:[%s887_s1 + $0x48] sm:$0xff]   ;;  %v739_v4 = vld [vmem:[%s887_s1 + $0x50] sm:$0xff]  }
   0x2   :  { %v663_v1 = vld [vmem:[%s887_s1] sm:$0xff]   ;;  %546 = vmatprep.subr.bf16.mxu0 %v662_v0  ;;  %574 = vmatprep.subr.bf16.mxu1 %v662_v0  ;;  %v734_v3 = vld [vmem:[%s887_s1 + $0x8] sm:$0xff]   ;;  %v746_v5 = vld [vmem:[%s887_s1 + $0x10] sm:$0xff]  }
   0x3   :  { %547 = vmatpush3.bf16.msra.mxu0 %v663_v1  ;;  %575 = vmatpush3.bf16.msra.mxu1 %v663_v1  ;;  %v753_v6 = vld [vmem:[%s887_s1 + $0x58] sm:$0xff]   ;;  %v767_v8 = vld [vmem:[%s887_s1 + $0x60] sm:$0xff]   ;;  %v672_v10 = vld [vmem:[%s887_s1 + $0x68] sm:$0xff]  }
   0x4   :  { %548 = vmatprep.subr.bf16.mxu0 %v664_v2  ;;  %576 = vmatprep.subr.bf16.mxu1 %v664_v2  ;;  %v760_v7 = vld [vmem:[%s887_s1 + $0x18] sm:$0xff]   ;;  %v774_v9 = vld [vmem:[%s887_s1 + $0x20] sm:$0xff]   ;;  %v673_v13 = vld [vmem:[%s887_s1 + $0x28] sm:$0xff]  }
   0x5   :  { %v680_v11 = vld [vmem:[%s888_s0 + $0x4] ss:$8 sps:$4 sm:$0xff]   ;;  %v674_v14 = vld [vmem:[%s887_s1 + $0x70] sm:$0xff]   ;;  %v676_v16 = vld [vmem:[%s887_s1 + $0x78] sm:$0x1f]  }
   0x6   :  { %v683_v12 = vld [vmem:[%s888_s0 + $0x24] ss:$8 sps:$4 sm:$0xff]   ;;  %513 = vmatprep.mubr.msk.bf16.mxu0 %vm164_vm0, %v680_v11  ;;  %v675_v15 = vld [vmem:[%s887_s1 + $0x30] sm:$0xff]   ;;  %v677_v17 = vld [vmem:[%s887_s1 + $0x38] sm:$0xff]  }
   0x7   :  { %549 = vmatpush3.bf16.msra.mxu0 %v734_v3  ;;  %577 = vmatpush3.bf16.msra.mxu1 %v734_v3  ;;  %v678_v18 = vld [vmem:[%s888_s0] ss:$8 sps:$4 sm:$0xff]   ;;  %v684_v20 = vld [vmem:[%s888_s0 + $0x14] ss:$8 sps:$4 sm:$0xff]   ;;  %v688_v22 = vld [vmem:[%s888_s0 + $0x10] ss:$8 sps:$4 sm:$0xff]  }
   0x8   :  { %550 = vmatprep.subr.bf16.mxu0 %v739_v4  ;;  %578 = vmatprep.subr.bf16.mxu1 %v739_v4  ;;  %v681_v19 = vld [vmem:[%s888_s0 + $0x20] ss:$8 sps:$4 sm:$0xff]   ;;  %v686_v21 = vld [vmem:[%s888_s0 + $0x34] ss:$8 sps:$4 sm:$0xff]   ;;  %v689_v23 = vld [vmem:[%s888_s0 + $0x30] ss:$8 sps:$4 sm:$0xff]  }
   0x9   :  { %523 = vmatprep.mubr.msk.bf16.mxu1 %vm164_vm0, %v683_v12  ;;  %v692_v24 = vld [vmem:[%s888_s0 + $0x44] ss:$8 sps:$4 sm:$0xff]   ;;  %v690_v26 = vld [vmem:[%s888_s0 + $0x40] ss:$8 sps:$4 sm:$0xff]   ;;  %v696_v28 = vld [vmem:[%s888_s0 + $0x54] ss:$8 sps:$4 sm:$0xff]  }
   0xa   :  { %v695_v25 = vld [vmem:[%s888_s0 + $0x64] ss:$8 sps:$4 sm:$0xff]   ;;  %v693_v27 = vld [vmem:[%s888_s0 + $0x60] ss:$8 sps:$4 sm:$0xff]   ;;  %v698_v29 = vld [vmem:[%s888_s0 + $0x74] ss:$8 sps:$4 sm:$0xff]  }
   0xb   :  { %551 = vmatpush3.bf16.msra.mxu0 %v746_v5  ;;  %579 = vmatpush3.bf16.msra.mxu1 %v746_v5  ;;  %v700_v30 = vld [vmem:[%s888_s0 + $0x50] ss:$8 sps:$4 sm:$0xff]  }
   0xc   :  { %552 = vmatprep.subr.bf16.mxu0 %v753_v6  ;;  %580 = vmatprep.subr.bf16.mxu1 %v753_v6  ;;  %v701_v31 = vld [vmem:[%s888_s0 + $0x70] ss:$8 sps:$4 sm:$0xff]  }
   0xf   :  { %553 = vmatpush3.bf16.msra.mxu0 %v760_v7  ;;  %581 = vmatpush3.bf16.msra.mxu1 %v760_v7 }
  0x10   :  { %554 = vmatprep.subr.bf16.mxu0 %v767_v8  ;;  %582 = vmatprep.subr.bf16.mxu1 %v767_v8 }
  0x13   :  { %555 = vmatpush3.bf16.msra.mxu0 %v774_v9  ;;  %583 = vmatpush3.bf16.msra.mxu1 %v774_v9 }
  0x14   :  { %556 = vmatprep.subr.bf16.mxu0 %v672_v10  ;;  %584 = vmatprep.subr.bf16.mxu1 %v672_v10 }
  0x17   :  { %557 = vmatpush3.bf16.msra.mxu0 %v673_v13  ;;  %585 = vmatpush3.bf16.msra.mxu1 %v673_v13 }
  0x18   :  { %558 = vmatprep.subr.bf16.mxu0 %v674_v14  ;;  %586 = vmatprep.subr.bf16.mxu1 %v674_v14 }
  0x1b   :  { %559 = vmatpush3.bf16.msra.mxu0 %v675_v15  ;;  %587 = vmatpush3.bf16.msra.mxu1 %v675_v15 }
  0x1c   :  { %658 = vmatprep.subr.msk.bf16.mxu0 %vm171_vm1, %v676_v16  ;;  %659 = vmatprep.subr.msk.bf16.mxu1 %vm171_vm1, %v676_v16 }
  0x1f   :  { %561 = vmatpush3.bf16.msra.mxu0 %v677_v17  ;;  %589 = vmatpush3.bf16.msra.mxu1 %v677_v17 }
  0x20   :  { %602 = vmatprep.subr.bf16.mxu0 %v662_v0  ;;  %630 = vmatprep.subr.bf16.mxu1 %v662_v0 }
  0x22   :  { %208 = vmatmul.mubr.bf16.vlgmr.msra.gmra.mrb[0].mxu0 %v678_v18  ;;  %286 = vmatmul.mubr.bf16.vlgmr.msra.gmra.mrb[0].mxu1 %v681_v19 }
  0x23   :  { %603 = vmatpush3.bf16.msra.mxu0 %v663_v1  ;;  %631 = vmatpush3.bf16.msra.mxu1 %v663_v1 }
  0x24   :  { %604 = vmatprep.subr.bf16.mxu0 %v664_v2  ;;  %632 = vmatprep.subr.bf16.mxu1 %v664_v2 }
  0x25   :  { %514 = vmatprep.mubr.msk.bf16.mxu0 %vm164_vm0, %v684_v20  ;;  %524 = vmatprep.mubr.msk.bf16.mxu1 %vm164_vm0, %v686_v21 }
  0x27   :  { %605 = vmatpush3.bf16.msra.mxu0 %v734_v3  ;;  %633 = vmatpush3.bf16.msra.mxu1 %v734_v3 }
  0x28   :  { %606 = vmatprep.subr.bf16.mxu0 %v739_v4  ;;  %634 = vmatprep.subr.bf16.mxu1 %v739_v4 }
  0x2a   :  { %216 = vmatmul.mubr.bf16.gmra.mrb[4].mxu0 %v688_v22  ;;  %294 = vmatmul.mubr.bf16.gmra.mrb[4].mxu1 %v689_v23 }
  0x2b   :  { %607 = vmatpush3.bf16.msra.mxu0 %v746_v5  ;;  %635 = vmatpush3.bf16.msra.mxu1 %v746_v5 }
  0x2c   :  { %608 = vmatprep.subr.bf16.mxu0 %v753_v6  ;;  %636 = vmatprep.subr.bf16.mxu1 %v753_v6 }
  0x2d   :  { %533 = vmatprep.mubr.msk.bf16.mxu0 %vm164_vm0, %v692_v24  ;;  %543 = vmatprep.mubr.msk.bf16.mxu1 %vm164_vm0, %v695_v25 }
  0x2f   :  { %609 = vmatpush3.bf16.msra.mxu0 %v760_v7  ;;  %637 = vmatpush3.bf16.msra.mxu1 %v760_v7 }
  0x30   :  { %610 = vmatprep.subr.bf16.mxu0 %v767_v8  ;;  %638 = vmatprep.subr.bf16.mxu1 %v767_v8 }
  0x33   :  { %611 = vmatpush3.bf16.msra.mxu0 %v774_v9  ;;  %639 = vmatpush3.bf16.msra.mxu1 %v774_v9  ;;  %v545_v9 = vld [vmem:[%s889_s2] ss:$0 sm:$0xff] }
  0x34   :  { %612 = vmatprep.subr.bf16.mxu0 %v672_v10  ;;  %640 = vmatprep.subr.bf16.mxu1 %v672_v10 }
  0x37   :  { %613 = vmatpush3.bf16.msra.mxu0 %v673_v13  ;;  %641 = vmatpush3.bf16.msra.mxu1 %v673_v13 }
  0x38   :  { %614 = vmatprep.subr.bf16.mxu0 %v674_v14  ;;  %642 = vmatprep.subr.bf16.mxu1 %v674_v14 }
  0x3b   :  { %615 = vmatpush3.bf16.msra.mxu0 %v675_v15  ;;  %643 = vmatpush3.bf16.msra.mxu1 %v675_v15 }
  0x3c   :  { %660 = vmatprep.subr.msk.bf16.mxu0 %vm171_vm1, %v676_v16  ;;  %661 = vmatprep.subr.msk.bf16.mxu1 %vm171_vm1, %v676_v16 }
  0x3f   :  { %617 = vmatpush3.bf16.msra.mxu0 %v677_v17  ;;  %645 = vmatpush3.bf16.msra.mxu1 %v677_v17 }
  0x42   :  { %364 = vmatmul.mubr.bf16.vlgmr.msra.gmra.mrb[8].mxu0 %v690_v26  ;;  %442 = vmatmul.mubr.bf16.vlgmr.msra.gmra.mrb[8].mxu1 %v693_v27 }
  0x43   :  { %534 = vmatprep.mubr.msk.bf16.mxu0 %vm164_vm0, %v696_v28  ;;  %544 = vmatprep.mubr.msk.bf16.mxu1 %vm164_vm0, %v698_v29 }
  0x4a   :  { %372 = vmatmul.mubr.bf16.gmra.mrb[12].mxu0 %v700_v30  ;;  %450 = vmatmul.mubr.bf16.gmra.mrb[12].mxu1 %v701_v31 }
  0xf5   :  { %v562_v32 = vpop.f32.mrb[0].mxu0  ;;  %v590_v33 = vpop.f32.mrb[0].mxu1 }
  0xf6   :  { %v563_v34 = vpop.f32.mrb[1].mxu0  ;;  %v591_v35 = vpop.f32.mrb[1].mxu1 }
  0xf7   :  { %v564_v36 = vadd.f32 %v563_v34, %v562_v32  ;;  %v592_v37 = vadd.f32 %v591_v35, %v590_v33  ;;  %v565_v38 = vpop.f32.mrb[2].mxu0  ;;  %v593_v39 = vpop.f32.mrb[2].mxu1 }
  0xf8   :  { %v566_v40 = vpop.f32.mrb[3].mxu0  ;;  %v594_v41 = vpop.f32.mrb[3].mxu1 }
  0xf9   :  { %v458_v42 = vmax.f32 %v564_v36, %v592_v37  ;;  %v567_v43 = vadd.f32 %v566_v40, %v565_v38  ;;  %v595_v44 = vadd.f32 %v594_v41, %v593_v39 }
  0xfb   :  { %v459_v45 = vmax.f32 %v567_v43, %v595_v44 }
  0xfd   :  { %v568_v46 = vpop.f32.mrb[4].mxu0  ;;  %v596_v47 = vpop.f32.mrb[4].mxu1 }
  0xfe   :  { %v569_v48 = vpop.f32.mrb[5].mxu0  ;;  %v597_v49 = vpop.f32.mrb[5].mxu1 }
  0xff   :  { %v570_v50 = vadd.f32 %v569_v48, %v568_v46  ;;  %v598_v51 = vadd.f32 %v597_v49, %v596_v47  ;;  %v571_v52 = vpop.f32.mrb[6].mxu0  ;;  %v599_v53 = vpop.f32.mrb[6].mxu1 }
 0x100   :  { %v572_v54 = vpop.f32.mrb[7].mxu0  ;;  %v600_v55 = vpop.f32.mrb[7].mxu1 }
 0x101   :  { %v460_v56 = vmax.f32 %v570_v50, %v598_v51  ;;  %v573_v57 = vadd.f32 %v572_v54, %v571_v52  ;;  %v601_v58 = vadd.f32 %v600_v55, %v599_v53 }
 0x103   :  { %v461_v59 = vmax.f32 %v573_v57, %v601_v58 }
 0x115   :  { %v618_v60 = vpop.f32.mrb[8].mxu0  ;;  %v646_v61 = vpop.f32.mrb[8].mxu1 }
 0x116   :  { %v619_v62 = vpop.f32.mrb[9].mxu0  ;;  %v647_v63 = vpop.f32.mrb[9].mxu1 }
 0x117   :  { %v620_v0 = vadd.f32 %v619_v62, %v618_v60  ;;  %v648_v1 = vadd.f32 %v647_v63, %v646_v61  ;;  %v621_v2 = vpop.f32.mrb[10].mxu0  ;;  %v649_v3 = vpop.f32.mrb[10].mxu1 }
 0x118   :  { %v622_v4 = vpop.f32.mrb[11].mxu0  ;;  %v650_v5 = vpop.f32.mrb[11].mxu1 }
 0x119   :  { %v462_v6 = vmax.f32 %v620_v0, %v648_v1  ;;  %v623_v7 = vadd.f32 %v622_v4, %v621_v2  ;;  %v651_v8 = vadd.f32 %v650_v5, %v649_v3 }
 0x11b   :  { %v466_v10 = vmax.f32 %v458_v42, %v462_v6  ;;  %v463_v11 = vmax.f32 %v623_v7, %v651_v8 }
 0x11d   :  { %v477_v12 = vadd.f32 %v545_v9, %v466_v10  ;;  %v467_v13 = vmax.f32 %v459_v45, %v463_v11  ;;  %v624_v14 = vpop.f32.mrb[12].mxu0  ;;  %v652_v15 = vpop.f32.mrb[12].mxu1 }
 0x11e   :  { %v625_v16 = vpop.f32.mrb[13].mxu0  ;;  %v653_v17 = vpop.f32.mrb[13].mxu1 }
 0x11f   :  { %v481_v18 = vmax.f32 %v477_v12, 0.0  ;;  %v478_v19 = vadd.f32 %v545_v9, %v467_v13  ;;  %v626_v20 = vadd.f32 %v625_v16, %v624_v14  ;;  %v654_v21 = vadd.f32 %v653_v17, %v652_v15  ;;  %v627_v22 = vpop.f32.mrb[14].mxu0  ;;  %v655_v23 = vpop.f32.mrb[14].mxu1 }
 0x120   :  { %v628_v24 = vpop.f32.mrb[15].mxu0  ;;  %v656_v25 = vpop.f32.mrb[15].mxu1 }
 0x121   :  { %485 = vst [vmem:[%s890_s3] sm:$0xff] %v481_v18  ;;  %v482_v26 = vmax.f32 %v478_v19, 0.0  ;;  %v464_v27 = vmax.f32 %v626_v20, %v654_v21  ;;  %v629_v28 = vadd.f32 %v628_v24, %v627_v22  ;;  %v657_v29 = vadd.f32 %v656_v25, %v655_v23 }
 0x123   :  { %486 = vst [vmem:[%s890_s3 + $0x8] sm:$0xff] %v482_v26  ;;  %v468_v30 = vmax.f32 %v460_v56, %v464_v27  ;;  %v465_v31 = vmax.f32 %v629_v28, %v657_v29 }
 0x125   :  { %v479_v32 = vadd.f32 %v545_v9, %v468_v30  ;;  %v469_v33 = vmax.f32 %v461_v59, %v465_v31 }
 0x127   :  { %v483_v34 = vmax.f32 %v479_v32, 0.0  ;;  %v480_v35 = vadd.f32 %v545_v9, %v469_v33 }
 0x129   :  { %487 = vst [vmem:[%s890_s3 + $0x10] sm:$0xff] %v483_v34  ;;  %v484_v36 = vmax.f32 %v480_v35, 0.0 }
 0x12b   :  { %488 = vst [vmem:[%s890_s3 + $0x18] sm:$0xff] %v484_v36 }

// kernel: net_forward.5
= control target key start
LH: loop header
LB: loop body
LE: loop exit
PB: predicated region body
PF: predicated region fallthrough
CT: control target
= control target key end

     0   :  { %v516_v3 = vmov 0.0|0.0   ;;  %vm517_vm0 = vmmov 0   ;;  %v518_v4 = vmov 0.0   ;;  %vm70_vm1 = vcmask 523264   ;;  %s751_s1 = inlined_call_operand.vmem [shape: f32[320,128], index: 1, kind: input, shape index: {}]   ;;  %s752_s0 = inlined_call_operand.vmem [shape: f32[8,320], index: 0, kind: input, shape index: {}]   ;;  %s753_s3 = inlined_call_operand.vmem [shape: f32[128,128], index: 3, kind: input, shape index: {}]   ;;  %s754_s2 = inlined_call_operand.vmem [shape: f32[1,128], index: 2, kind: input, shape index: {}]   ;;  %s755_s4 = inlined_call_operand.vmem [shape: f32[1,128], index: 4, kind: input, shape index: {}]   ;;  %s756_s5 = inlined_call_operand.vmem [shape: f32[8,128], index: 5, kind: output, shape index: {}]  }
   0x1   :  { %v39_v0 = vld [vmem:[%s751_s1 + $0x80] sm:$0xff]  ;;  %v40_v1 = vld [vmem:[%s751_s1 + $0x88] sm:$0xff]  ;;  %473 = vmatprep.subr.bf16.mxu1 %v516_v3  ;;  %403 = vmatprep.mubr.msk.f32.mxu1 %vm517_vm0, %v518_v4  ;;  %v41_v7 = vld [vmem:[%s751_s1 + $0x90] sm:$0xff] }
   0x2   :  { %v23_v2 = vld [vmem:[%s751_s1] sm:$0xff]  ;;  %v441_v5 = vpack.c.bf16 %v40_v1, %v39_v0  ;;  %v24_v6 = vld [vmem:[%s751_s1 + $0x8] sm:$0xff]  ;;  %v42_v8 = vld [vmem:[%s751_s1 + $0x98] sm:$0xff] }
   0x3   :  { %v443_v9 = vpack.c.bf16 %v24_v6, %v23_v2  ;;  %v445_v10 = vpack.c.bf16 %v42_v8, %v41_v7  ;;  %v25_v11 = vld [vmem:[%s751_s1 + $0x10] sm:$0xff]  ;;  %v26_v12 = vld [vmem:[%s751_s1 + $0x18] sm:$0xff]  ;;  %v43_v13 = vld [vmem:[%s751_s1 + $0xa0] sm:$0xff] }
   0x4   :  { %442 = vmatprep.subr.bf16.mxu0 %v441_v5  ;;  %v44_v14 = vld [vmem:[%s751_s1 + $0xa8] sm:$0xff]  ;;  %v447_v15 = vpack.c.bf16 %v26_v12, %v25_v11  ;;  %v27_v17 = vld [vmem:[%s751_s1 + $0x20] sm:$0xff]  ;;  %v45_v19 = vld [vmem:[%s751_s1 + $0xb0] sm:$0xff] }
   0x5   :  { %444 = vmatpush3.bf16.msra.mxu0 %v443_v9  ;;  %v449_v16 = vpack.c.bf16 %v44_v14, %v43_v13  ;;  %v28_v18 = vld [vmem:[%s751_s1 + $0x28] sm:$0xff]  ;;  %v46_v20 = vld [vmem:[%s751_s1 + $0xb8] sm:$0xff]  ;;  %v55_v22 = vld [vmem:[%s751_s1 + $0x100] sm:$0xff] }
   0x6   :  { %446 = vmatprep.subr.bf16.mxu0 %v445_v10  ;;  %v451_v21 = vpack.c.bf16 %v28_v18, %v27_v17  ;;  %v56_v23 = vld [vmem:[%s751_s1 + $0x108] sm:$0xff]  ;;  %v453_v24 = vpack.c.bf16 %v46_v20, %v45_v19  ;;  %v29_v25 = vld [vmem:[%s751_s1 + $0x30] sm:$0xff]  ;;  %v30_v26 = vld [vmem:[%s751_s1 + $0x38] sm:$0xff] }
   0x7   :  { %v47_v27 = vld [vmem:[%s751_s1 + $0xc0] sm:$0xff]  ;;  %v474_v28 = vpack.c.bf16 %v56_v23, %v55_v22  ;;  %v48_v29 = vld [vmem:[%s751_s1 + $0xc8] sm:$0xff]  ;;  %v57_v30 = vld [vmem:[%s751_s1 + $0x110] sm:$0xff]  ;;  %v455_v33 = vpack.c.bf16 %v30_v26, %v29_v25 }
   0x8   :  { %v58_v31 = vld [vmem:[%s751_s1 + $0x118] sm:$0xff]  ;;  %v59_v34 = vld [vmem:[%s751_s1 + $0x120] sm:$0xff]  ;;  %v60_v35 = vld [vmem:[%s751_s1 + $0x128] sm:$0xff]  ;;  %v457_v37 = vpack.c.bf16 %v48_v29, %v47_v27 }
   0x9   :  { %448 = vmatpush3.bf16.msra.mxu0 %v447_v15  ;;  %475 = vmatpush3.bf16.msra.mxu1 %v474_v28  ;;  %v477_v32 = vpack.c.bf16 %v58_v31, %v57_v30  ;;  %v21_v36 = vld [vmem:[%s752_s0 + $0x8] sm:$0xff]  ;;  %v31_v38 = vld [vmem:[%s751_s1 + $0x40] sm:$0xff]  ;;  %v49_v40 = vld [vmem:[%s751_s1 + $0xd0] sm:$0xff]  ;;  %v480_v42 = vpack.c.bf16 %v60_v35, %v59_v34 }
   0xa   :  { %450 = vmatprep.subr.bf16.mxu0 %v449_v16  ;;  %476 = vmatprep.subr.bf16.mxu1 %v516_v3  ;;  %v32_v39 = vld [vmem:[%s751_s1 + $0x48] sm:$0xff]  ;;  %v50_v41 = vld [vmem:[%s751_s1 + $0xd8] sm:$0xff]  ;;  %v61_v44 = vld [vmem:[%s751_s1 + $0x130] sm:$0xff] }
   0xb   :  { %138 = vmatprep.mubr.f32.mxu0 %v21_v36  ;;  %v459_v43 = vpack.c.bf16 %v32_v39, %v31_v38  ;;  %v62_v45 = vld [vmem:[%s751_s1 + $0x138] sm:$0xff]  ;;  %v461_v46 = vpack.c.bf16 %v50_v41, %v49_v40  ;;  %v33_v47 = vld [vmem:[%s751_s1 + $0x50] sm:$0xff]  ;;  %v51_v49 = vld [vmem:[%s751_s1 + $0xe0] sm:$0xff] }
   0xc   :  { %v34_v48 = vld [vmem:[%s751_s1 + $0x58] sm:$0xff]  ;;  %v52_v50 = vld [vmem:[%s751_s1 + $0xe8] sm:$0xff]  ;;  %v483_v51 = vpack.c.bf16 %v62_v45, %v61_v44  ;;  %v215_v53 = vld [vmem:[%s753_s3] sm:$0xff] }
   0xd   :  { %452 = vmatpush3.bf16.msra.mxu0 %v451_v21  ;;  %478 = vmatpush3.bf16.msra.mxu1 %v477_v32  ;;  %v463_v52 = vpack.c.bf16 %v34_v48, %v33_v47  ;;  %v216_v54 = vld [vmem:[%s753_s3 + $0x8] sm:$0xff]  ;;  %v465_v55 = vpack.c.bf16 %v52_v50, %v51_v49  ;;  %v35_v56 = vld [vmem:[%s751_s1 + $0x60] sm:$0xff]  ;;  %v53_v58 = vld [vmem:[%s751_s1 + $0xf0] sm:$0xff] }
   0xe   :  { %454 = vmatprep.subr.bf16.mxu0 %v453_v24  ;;  %479 = vmatprep.subr.bf16.mxu1 %v516_v3  ;;  %v36_v57 = vld [vmem:[%s751_s1 + $0x68] sm:$0xff]  ;;  %v54_v59 = vld [vmem:[%s751_s1 + $0xf8] sm:$0xff]  ;;  %v22_v60 = vld [vmem:[%s752_s0 + $0x10] sm:$0xff]  ;;  %v486_v61 = vpack.c.bf16 %v216_v54, %v215_v53 }
   0xf   :  { %v467_v62 = vpack.c.bf16 %v36_v57, %v35_v56  ;;  %v217_v63 = vld [vmem:[%s753_s3 + $0x10] sm:$0xff]  ;;  %v218_v0 = vld [vmem:[%s753_s3 + $0x18] sm:$0xff]  ;;  %v469_v1 = vpack.c.bf16 %v54_v59, %v53_v58  ;;  %v219_v8 = vld [vmem:[%s753_s3 + $0x20] sm:$0xff] }
  0x10   :  { %v37_v2 = vld [vmem:[%s751_s1 + $0x70] sm:$0xff]  ;;  %v38_v5 = vld [vmem:[%s751_s1 + $0x78] sm:$0xff]  ;;  %v489_v6 = vpack.c.bf16 %v218_v0, %v217_v63  ;;  %v220_v9 = vld [vmem:[%s753_s3 + $0x28] sm:$0xff] }
  0x11   :  { %456 = vmatpush3.bf16.msra.mxu0 %v455_v33  ;;  %481 = vmatpush3.bf16.msra.mxu1 %v480_v42  ;;  %v471_v7 = vpack.c.bf16 %v38_v5, %v37_v2  ;;  %v492_v10 = vpack.c.bf16 %v220_v9, %v219_v8  ;;  %v221_v11 = vld [vmem:[%s753_s3 + $0x30] sm:$0xff]  ;;  %v222_v12 = vld [vmem:[%s753_s3 + $0x38] sm:$0xff]  ;;  %v223_v14 = vld [vmem:[%s753_s3 + $0x40] sm:$0xff] }
  0x12   :  { %458 = vmatprep.subr.bf16.mxu0 %v457_v37  ;;  %482 = vmatprep.subr.bf16.mxu1 %v516_v3  ;;  %v495_v13 = vpack.c.bf16 %v222_v12, %v221_v11  ;;  %v224_v15 = vld [vmem:[%s753_s3 + $0x48] sm:$0xff]  ;;  %v225_v17 = vld [vmem:[%s753_s3 + $0x50] sm:$0xff]  ;;  %v226_v18 = vld [vmem:[%s753_s3 + $0x58] sm:$0xff] }
  0x13   :  { %v498_v16 = vpack.c.bf16 %v224_v15, %v223_v14  ;;  %v501_v19 = vpack.c.bf16 %v226_v18, %v225_v17  ;;  %v227_v20 = vld [vmem:[%s753_s3 + $0x60] sm:$0xff]  ;;  %v228_v21 = vld [vmem:[%s753_s3 + $0x68] sm:$0xff]  ;;  %v229_v23 = vld [vmem:[%s753_s3 + $0x70] sm:$0xff] }
  0x14   :  { %v504_v22 = vpack.c.bf16 %v228_v21, %v227_v20  ;;  %v230_v24 = vld [vmem:[%s753_s3 + $0x78] sm:$0xff]  ;;  %v323_v30 = vld [vmem:[%s754_s2] ss:$0 sm:$0xff] }
  0x15   :  { %460 = vmatpush3.bf16.msra.mxu0 %v459_v43  ;;  %484 = vmatpush3.bf16.msra.mxu1 %v483_v51  ;;  %v507_v25 = vpack.c.bf16 %v230_v24, %v229_v23  ;;  %v325_v34 = vld [vmem:[%s755_s4] ss:$0 sm:$0xff] }
  0x16   :  { %462 = vmatprep.subr.bf16.mxu0 %v461_v46  ;;  %485 = vmatprep.subr.bf16.mxu1 %v516_v3 }
  0x18   :  { %404 = vmatmul.mubr.msk.f32.vlgmr.msra.gmra.mrb[0].mxu1 %vm70_vm1, %v22_v60 }
  0x19   :  { %464 = vmatpush3.bf16.msra.mxu0 %v463_v52  ;;  %487 = vmatpush3.bf16.msra.mxu1 %v486_v61 }
  0x1a   :  { %466 = vmatprep.subr.bf16.mxu0 %v465_v55  ;;  %438 = vmatprep.mubr.msk.f32.mxu1 %vm517_vm0, %v518_v4  ;;  %v20_v4 = vld [vmem:[%s752_s0] sm:$0xff] }
  0x1b   :  { %488 = vmatprep.subr.bf16.mxu1 %v516_v3 }
  0x1d   :  { %468 = vmatpush3.bf16.msra.mxu0 %v467_v62  ;;  %490 = vmatpush3.bf16.msra.mxu1 %v489_v6 }
  0x1e   :  { %470 = vmatprep.subr.bf16.mxu0 %v469_v1  ;;  %491 = vmatprep.subr.bf16.mxu1 %v516_v3 }
  0x21   :  { %472 = vmatpush3.bf16.msra.mxu0 %v471_v7  ;;  %493 = vmatpush3.bf16.msra.mxu1 %v492_v10 }
  0x22   :  { %494 = vmatprep.subr.bf16.mxu1 %v516_v3 }
  0x24   :  { %139 = vmatmul.mubr.f32.vlgmr.msra.gmra.mrb[0].mxu0 %v20_v4 }
  0x25   :  { %496 = vmatpush3.bf16.msra.mxu1 %v495_v13 }
  0x26   :  { %497 = vmatprep.subr.bf16.mxu1 %v516_v3 }
  0x29   :  { %499 = vmatpush3.bf16.msra.mxu1 %v498_v16 }
  0x2a   :  { %500 = vmatprep.subr.bf16.mxu1 %v516_v3 }
  0x2d   :  { %502 = vmatpush3.bf16.msra.mxu1 %v501_v19 }
  0x2e   :  { %503 = vmatprep.subr.bf16.mxu1 %v516_v3 }
  0x31   :  { %505 = vmatpush3.bf16.msra.mxu1 %v504_v22 }
  0x32   :  { %506 = vmatprep.subr.bf16.mxu1 %v516_v3 }
  0x35   :  { %508 = vmatpush3.bf16.msra.mxu1 %v507_v25 }
  0xeb   :  { %v210_v26 = vpop.f32.mrb[0].mxu1 }
  0xec   :  { %v405_v27 = vpop.f32.mrb[1].mxu1 }
  0xf7   :  { %v358_v28 = vpop.f32.mrb[0].mxu0 }
  0xf8   :  { %v359_v29 = vpop.f32.mrb[1].mxu0 }
  0xf9   :  { %v360_v31 = vadd.f32 %v359_v29, %v358_v28 }
  0xfb   :  { %v141_v3 = vadd.f32 %v360_v31, %v323_v30 }
  0xfd   :  { %v211_v32 = vadd.f32 %v210_v26, %v141_v3 }
  0xff   :  { %v214_v33 = vmax.f32 %v211_v32, 0.0 }
 0x101   :  { %439 = vmatmul.mubr.f32.vlgmr.msra.gmra.mrb[2].mxu1 %v214_v33 }
 0x1d4   :  { %v304_v35 = vpop.f32.mrb[2].mxu1 }
 0x1d5   :  { %v305_v36 = vadd.f32 %v325_v34, %v304_v35  ;;  %v440_v37 = vpop.f32.mrb[3].mxu1 }
 0x1d7   :  { %308 = vmax.xlane.f32.xlu0 %v305_v36 }
 0x264   :  { %v309_v38 = vpop.xlane.xlu0 %308 }
 0x265   :  { %v310_v39 = vsub.f32 %v305_v36, %v309_v38 }
 0x267   :  { %v311_v40 = vmul.f32 1.442695, %v310_v39 }
 0x269   :  { %512 = vpow2.f32 %v311_v40 }
 0x273   :  { %v513_v41 = vpop.eup %512 }
 0x274   :  { %313 = vadd.xlane.f32.xlu0 %v513_v41 }
 0x301   :  { %v314_v42 = vpop.xlane.xlu0 %313 }
 0x302   :  { %514 = vlog2.f32 %v314_v42 }
 0x30c   :  { %v515_v43 = vpop.eup %514 }
 0x30d   :  { %v316_v44 = vmul.f32 0.6931472, %v515_v43 }
 0x30f   :  { %v317_v45 = vsub.f32 %v310_v39, %v316_v44 }
 0x311   :  { %318 = vst [vmem:[%s756_s5] sm:$0xff] %v317_v45 }

</bundles_post_ra>
